<compile_context>
chip_gen: v5e
topology: v5e:2x2
jax: 0.10.0
libtpu: 0.0.40
codegen_flags: <defaults>
</compile_context>

<pallas_src>
import jax
import jax.numpy as jnp
from jax.experimental import pallas as pl
from jax.experimental.pallas import tpu as pltpu

Z_DIM = 3
COND_DIM = 2
X_DIM = 2
D_HIDDEN = 128
D_IN = Z_DIM + COND_DIM        # 5
D_IN_PAD = 16                  # pad concat'd input features to the bf16-native sublane pack
TB_DEFAULT = 512               # batch tile (lanes); 512 keeps the MXU fed across the 4 layers


def _round_up(n, m):
    return ((n + m - 1) // m) * m


def _generator_kernel(x_ref, w1_ref, b1_ref, w2_ref, b2_ref, w3_ref, b3_ref,
                      w4_ref, b4_ref, o_ref):
    # Batch-on-lanes: activations are (features, batch_tile); weights are the MXU LHS.
    # x_ref: (D_IN_PAD, TB) bf16 ; w1_ref: (128, D_IN_PAD) bf16 -> h: (128, TB) f32
    h = jnp.dot(w1_ref[...], x_ref[...], preferred_element_type=jnp.float32)
    h = jnp.maximum(h + b1_ref[...], 0.0)
    h = jnp.dot(w2_ref[...], h.astype(jnp.bfloat16),
                preferred_element_type=jnp.float32)
    h = jnp.maximum(h + b2_ref[...], 0.0)
    h = jnp.dot(w3_ref[...], h.astype(jnp.bfloat16),
                preferred_element_type=jnp.float32)
    h = jnp.maximum(h + b3_ref[...], 0.0)
    o = jnp.dot(w4_ref[...], h.astype(jnp.bfloat16),
                preferred_element_type=jnp.float32)                  # (X_DIM, TB)
    o = jnp.maximum(o + b4_ref[...], 0.0)       # original module applies activation to the last layer
    o_ref[...] = o.astype(o_ref.dtype)


def _pallas_mlp(xt, w1t, b1c, w2t, b2c, w3t, b3c, w4t, b4c, *, tb,
                single_buffer_weights):
    d_in_pad, bp = xt.shape
    grid = (bp // tb,)
    weight_mode = pl.Buffered(buffer_count=1) if single_buffer_weights else None

    def const_spec(shape):
        # index_map is constant -> operand never re-fetched; single-buffer it when supported.
        if weight_mode is None:
            return pl.BlockSpec(shape, lambda i: (0, 0))
        return pl.BlockSpec(shape, lambda i: (0, 0), pipeline_mode=weight_mode)

    return pl.pallas_call(
        _generator_kernel,
        out_shape=jax.ShapeDtypeStruct((X_DIM, bp), jnp.float32),
        grid_spec=pltpu.PrefetchScalarGridSpec(
            num_scalar_prefetch=0,
            grid=grid,
            in_specs=[
                pl.BlockSpec((d_in_pad, tb), lambda i: (0, i)),   # x^T  (batch on lanes)
                const_spec((D_HIDDEN, d_in_pad)),                 # w1^T (padded input cols)
                const_spec((D_HIDDEN, 1)),                        # b1
                const_spec((D_HIDDEN, D_HIDDEN)),                 # w2^T
                const_spec((D_HIDDEN, 1)),                        # b2
                const_spec((D_HIDDEN, D_HIDDEN)),                 # w3^T
                const_spec((D_HIDDEN, 1)),                        # b3
                const_spec((X_DIM, D_HIDDEN)),                    # w4^T
                const_spec((X_DIM, 1)),                           # b4
            ],
            out_specs=pl.BlockSpec((X_DIM, tb), lambda i: (0, i)),
        ),
        compiler_params=pltpu.CompilerParams(
            dimension_semantics=("parallel",)),
    )(xt, w1t, b1c, w2t, b2c, w3t, b3c, w4t, b4c)


def generator_forward(params, context, noise=None, *, key=None, tb=TB_DEFAULT):
    """context: (B, cond_dim), noise: (B, z_dim) -> (B, x_dim) float32 (eval-mode forward)."""
    w1, b1, w2, b2, w3, b3, w4, b4 = params
    B = context.shape[0]
    if noise is None:
        if key is None:
            key = jax.random.PRNGKey(0)
        noise = jax.random.normal(key, (B, Z_DIM), jnp.float32)

    xc = jnp.concatenate([noise, context], axis=-1)              # (B, 5)
    d_in = xc.shape[-1]

    # Batch-on-lanes layout: batch maps to the 128-wide lane axis. Shrink the tile for
    # small batches so we never pad past the next 128 multiple; larger batches get
    # multiple grid steps (so v7x's two TensorCores both run via "parallel" semantics).
    tb_eff = min(tb, _round_up(B, 128))
    bp = _round_up(B, tb_eff)

    xt = jnp.zeros((D_IN_PAD, bp), jnp.bfloat16)
    xt = xt.at[:d_in, :B].set(xc.T.astype(jnp.bfloat16))

    # Weights as MXU LHS (out_features, in_features) in bf16; biases stay f32 columns.
    w1t = jnp.zeros((D_HIDDEN, D_IN_PAD), jnp.bfloat16).at[:, :d_in].set(
        w1.T.astype(jnp.bfloat16))
    w2t = w2.T.astype(jnp.bfloat16)
    w3t = w3.T.astype(jnp.bfloat16)
    w4t = w4.T.astype(jnp.bfloat16)                              # (X_DIM, 128)
    b1c = b1.reshape(D_HIDDEN, 1).astype(jnp.float32)
    b2c = b2.reshape(D_HIDDEN, 1).astype(jnp.float32)
    b3c = b3.reshape(D_HIDDEN, 1).astype(jnp.float32)
    b4c = b4.reshape(X_DIM, 1).astype(jnp.float32)

    args = (xt, w1t, b1c, w2t, b2c, w3t, b3c, w4t, b4c)
    try:
        out_t = jax.block_until_ready(
            _pallas_mlp(*args, tb=tb_eff, single_buffer_weights=True))
    except Exception:
        # pl.Buffered(1) (single-buffering the grid-invariant weights) may not be
        # accepted by every jax/libtpu build; fall back to default double-buffering.
        out_t = _pallas_mlp(*args, tb=tb_eff, single_buffer_weights=False)

    return out_t[:, :B].T                                        # (B, X_DIM)


def init_params(key):
    """Deterministic param init matching nn.Linear shapes (stored as (in, out))."""
    d_in_list = [Z_DIM + COND_DIM, D_HIDDEN, D_HIDDEN, D_HIDDEN]
    d_out_list = [D_HIDDEN, D_HIDDEN, D_HIDDEN, X_DIM]
    params = []
    for d_i, d_o in zip(d_in_list, d_out_list):
        key, kw, kb = jax.random.split(key, 3)
        bound = 1.0 / jnp.sqrt(d_i)
        w = jax.random.uniform(kw, (d_i, d_o), jnp.float32, -bound, bound)
        b = jax.random.uniform(kb, (d_o,), jnp.float32, -bound, bound)
        params += [w, b]
    return tuple(params)


def generator_ref(params, context, noise):
    """Pure-JAX f32 reference (eval-mode forward of the Generator module)."""
    w1, b1, w2, b2, w3, b3, w4, b4 = params
    h = jnp.concatenate([noise, context], axis=-1)
    h = jax.nn.relu(h @ w1 + b1)
    h = jax.nn.relu(h @ w2 + b2)
    h = jax.nn.relu(h @ w3 + b3)
    return jax.nn.relu(h @ w4 + b4)   # activation (and eval-mode dropout) on every layer


if __name__ == "__main__":
    key = jax.random.PRNGKey(0)
    kp, kc, kn = jax.random.split(key, 3)
    params = init_params(kp)

    B = 8
    context = jax.random.normal(kc, (B, COND_DIM), jnp.float32)
    noise = jax.random.normal(kn, (B, Z_DIM), jnp.float32)

    out = generator_forward(params, context, noise)
    out = jax.block_until_ready(out)

    ref = generator_ref(params, context, noise)
    assert out.shape == (B, X_DIM), out.shape
    # bf16 MXU operands with f32 accumulation -> loosened tolerance vs the f32 reference.
    assert jnp.allclose(out, ref, atol=5e-2, rtol=5e-2), (out, ref)

    print("KERNEL_OK")
</pallas_src>

<mosaic_0001>
module attributes {stable_mosaic.version = 11 : i64} {
  func.func @_generator_kernel(%arg0: i32, %arg1: memref<16x128xbf16, #tpu.memory_space<vmem>>, %arg2: memref<128x16xbf16, #tpu.memory_space<vmem>>, %arg3: memref<128x1xf32, #tpu.memory_space<vmem>>, %arg4: memref<128x128xbf16, #tpu.memory_space<vmem>>, %arg5: memref<128x1xf32, #tpu.memory_space<vmem>>, %arg6: memref<128x128xbf16, #tpu.memory_space<vmem>>, %arg7: memref<128x1xf32, #tpu.memory_space<vmem>>, %arg8: memref<2x128xbf16, #tpu.memory_space<vmem>>, %arg9: memref<2x1xf32, #tpu.memory_space<vmem>>, %arg10: memref<2x128xf32, #tpu.memory_space<vmem>>) attributes {dimension_semantics = [#tpu.dimension_semantics<parallel>], iteration_bounds = array<i64: 1>, scalar_prefetch = 0 : i64, scratch_operands = 0 : i64, tpu.core_type = #tpu.core_type<tc>, window_params = [{transform_indices = @transform_0, window_bounds = array<i64: 16, 128>}, {pipeline_mode = #tpu.pipeline_mode<synchronous>, transform_indices = @transform_1, window_bounds = array<i64: 128, 16>}, {pipeline_mode = #tpu.pipeline_mode<synchronous>, transform_indices = @transform_2, window_bounds = array<i64: 128, 1>}, {pipeline_mode = #tpu.pipeline_mode<synchronous>, transform_indices = @transform_3, window_bounds = array<i64: 128, 128>}, {pipeline_mode = #tpu.pipeline_mode<synchronous>, transform_indices = @transform_4, window_bounds = array<i64: 128, 1>}, {pipeline_mode = #tpu.pipeline_mode<synchronous>, transform_indices = @transform_5, window_bounds = array<i64: 128, 128>}, {pipeline_mode = #tpu.pipeline_mode<synchronous>, transform_indices = @transform_6, window_bounds = array<i64: 128, 1>}, {pipeline_mode = #tpu.pipeline_mode<synchronous>, transform_indices = @transform_7, window_bounds = array<i64: 2, 128>}, {pipeline_mode = #tpu.pipeline_mode<synchronous>, transform_indices = @transform_8, window_bounds = array<i64: 2, 1>}, {transform_indices = @transform_9, window_bounds = array<i64: 2, 128>}]} {
    %c0 = arith.constant 0 : index
    %c0_0 = arith.constant 0 : index
    %0 = vector.load %arg2[%c0, %c0_0] : memref<128x16xbf16, #tpu.memory_space<vmem>>, vector<128x16xbf16>
    %c0_1 = arith.constant 0 : index
    %c0_2 = arith.constant 0 : index
    %1 = vector.load %arg1[%c0_1, %c0_2] : memref<16x128xbf16, #tpu.memory_space<vmem>>, vector<16x128xbf16>
    %cst = arith.constant dense<0.000000e+00> : vector<128x128xf32>
    %2 = tpu.matmul %0, %1, %cst {dimension_numbers = #tpu.dot_dimension_numbers<[1], [0], [0], [1], [0, 0, 1, 1], [], []>} : vector<128x16xbf16>, vector<16x128xbf16>, vector<128x128xf32> -> vector<128x128xf32>
    %c0_3 = arith.constant 0 : index
    %c0_4 = arith.constant 0 : index
    %3 = vector.load %arg3[%c0_3, %c0_4] : memref<128x1xf32, #tpu.memory_space<vmem>>, vector<128x1xf32>
    %4 = vector.broadcast %3 : vector<128x1xf32> to vector<128x128xf32>
    %5 = arith.addf %2, %4 : vector<128x128xf32>
    %cst_5 = arith.constant 0.000000e+00 : f32
    %6 = vector.broadcast %cst_5 : f32 to vector<128x128xf32>
    %7 = arith.maximumf %5, %6 : vector<128x128xf32>
    %c0_6 = arith.constant 0 : index
    %c0_7 = arith.constant 0 : index
    %8 = vector.load %arg4[%c0_6, %c0_7] : memref<128x128xbf16, #tpu.memory_space<vmem>>, vector<128x128xbf16>
    %9 = arith.truncf %7 : vector<128x128xf32> to vector<128x128xbf16>
    %cst_8 = arith.constant dense<0.000000e+00> : vector<128x128xf32>
    %10 = tpu.matmul %8, %9, %cst_8 {dimension_numbers = #tpu.dot_dimension_numbers<[1], [0], [0], [1], [0, 0, 1, 1], [], []>} : vector<128x128xbf16>, vector<128x128xbf16>, vector<128x128xf32> -> vector<128x128xf32>
    %c0_9 = arith.constant 0 : index
    %c0_10 = arith.constant 0 : index
    %11 = vector.load %arg5[%c0_9, %c0_10] : memref<128x1xf32, #tpu.memory_space<vmem>>, vector<128x1xf32>
    %12 = vector.broadcast %11 : vector<128x1xf32> to vector<128x128xf32>
    %13 = arith.addf %10, %12 : vector<128x128xf32>
    %cst_11 = arith.constant 0.000000e+00 : f32
    %14 = vector.broadcast %cst_11 : f32 to vector<128x128xf32>
    %15 = arith.maximumf %13, %14 : vector<128x128xf32>
    %c0_12 = arith.constant 0 : index
    %c0_13 = arith.constant 0 : index
    %16 = vector.load %arg6[%c0_12, %c0_13] : memref<128x128xbf16, #tpu.memory_space<vmem>>, vector<128x128xbf16>
    %17 = arith.truncf %15 : vector<128x128xf32> to vector<128x128xbf16>
    %cst_14 = arith.constant dense<0.000000e+00> : vector<128x128xf32>
    %18 = tpu.matmul %16, %17, %cst_14 {dimension_numbers = #tpu.dot_dimension_numbers<[1], [0], [0], [1], [0, 0, 1, 1], [], []>} : vector<128x128xbf16>, vector<128x128xbf16>, vector<128x128xf32> -> vector<128x128xf32>
    %c0_15 = arith.constant 0 : index
    %c0_16 = arith.constant 0 : index
    %19 = vector.load %arg7[%c0_15, %c0_16] : memref<128x1xf32, #tpu.memory_space<vmem>>, vector<128x1xf32>
    %20 = vector.broadcast %19 : vector<128x1xf32> to vector<128x128xf32>
    %21 = arith.addf %18, %20 : vector<128x128xf32>
    %cst_17 = arith.constant 0.000000e+00 : f32
    %22 = vector.broadcast %cst_17 : f32 to vector<128x128xf32>
    %23 = arith.maximumf %21, %22 : vector<128x128xf32>
    %c0_18 = arith.constant 0 : index
    %c0_19 = arith.constant 0 : index
    %24 = vector.load %arg8[%c0_18, %c0_19] : memref<2x128xbf16, #tpu.memory_space<vmem>>, vector<2x128xbf16>
    %25 = arith.truncf %23 : vector<128x128xf32> to vector<128x128xbf16>
    %cst_20 = arith.constant dense<0.000000e+00> : vector<2x128xf32>
    %26 = tpu.matmul %24, %25, %cst_20 {dimension_numbers = #tpu.dot_dimension_numbers<[1], [0], [0], [1], [0, 0, 1, 1], [], []>} : vector<2x128xbf16>, vector<128x128xbf16>, vector<2x128xf32> -> vector<2x128xf32>
    %c0_21 = arith.constant 0 : index
    %c0_22 = arith.constant 0 : index
    %27 = vector.load %arg9[%c0_21, %c0_22] : memref<2x1xf32, #tpu.memory_space<vmem>>, vector<2x1xf32>
    %28 = vector.broadcast %27 : vector<2x1xf32> to vector<2x128xf32>
    %29 = arith.addf %26, %28 : vector<2x128xf32>
    %cst_23 = arith.constant 0.000000e+00 : f32
    %30 = vector.broadcast %cst_23 : f32 to vector<2x128xf32>
    %31 = arith.maximumf %29, %30 : vector<2x128xf32>
    %c0_24 = arith.constant 0 : index
    %c0_25 = arith.constant 0 : index
    %32 = vector.load %arg10[%c0_24, %c0_25] : memref<2x128xf32, #tpu.memory_space<vmem>>, vector<2x128xf32>
    tpu.vector_store %arg10[%c0_24, %c0_25], %31 {strides = array<i32>} : memref<2x128xf32, #tpu.memory_space<vmem>>, vector<2x128xf32>,
    return
  }
  func.func @transform_0(%arg0: i32) -> (i32, i32) {
    %c0_i32 = arith.constant 0 : i32
    %c0_i32_0 = arith.constant 0 : i32
    return %c0_i32, %arg0 : i32, i32
  }
  func.func @transform_1(%arg0: i32) -> (i32, i32) {
    %c0_i32 = arith.constant 0 : i32
    %c0_i32_0 = arith.constant 0 : i32
    %c0_i32_1 = arith.constant 0 : i32
    return %c0_i32, %c0_i32_0 : i32, i32
  }
  func.func @transform_2(%arg0: i32) -> (i32, i32) {
    %c0_i32 = arith.constant 0 : i32
    %c0_i32_0 = arith.constant 0 : i32
    %c0_i32_1 = arith.constant 0 : i32
    return %c0_i32, %c0_i32_0 : i32, i32
  }
  func.func @transform_3(%arg0: i32) -> (i32, i32) {
    %c0_i32 = arith.constant 0 : i32
    %c0_i32_0 = arith.constant 0 : i32
    %c0_i32_1 = arith.constant 0 : i32
    return %c0_i32, %c0_i32_0 : i32, i32
  }
  func.func @transform_4(%arg0: i32) -> (i32, i32) {
    %c0_i32 = arith.constant 0 : i32
    %c0_i32_0 = arith.constant 0 : i32
    %c0_i32_1 = arith.constant 0 : i32
    return %c0_i32, %c0_i32_0 : i32, i32
  }
  func.func @transform_5(%arg0: i32) -> (i32, i32) {
    %c0_i32 = arith.constant 0 : i32
    %c0_i32_0 = arith.constant 0 : i32
    %c0_i32_1 = arith.constant 0 : i32
    return %c0_i32, %c0_i32_0 : i32, i32
  }
  func.func @transform_6(%arg0: i32) -> (i32, i32) {
    %c0_i32 = arith.constant 0 : i32
    %c0_i32_0 = arith.constant 0 : i32
    %c0_i32_1 = arith.constant 0 : i32
    return %c0_i32, %c0_i32_0 : i32, i32
  }
  func.func @transform_7(%arg0: i32) -> (i32, i32) {
    %c0_i32 = arith.constant 0 : i32
    %c0_i32_0 = arith.constant 0 : i32
    %c0_i32_1 = arith.constant 0 : i32
    return %c0_i32, %c0_i32_0 : i32, i32
  }
  func.func @transform_8(%arg0: i32) -> (i32, i32) {
    %c0_i32 = arith.constant 0 : i32
    %c0_i32_0 = arith.constant 0 : i32
    %c0_i32_1 = arith.constant 0 : i32
    return %c0_i32, %c0_i32_0 : i32, i32
  }
  func.func @transform_9(%arg0: i32) -> (i32, i32) {
    %c0_i32 = arith.constant 0 : i32
    %c0_i32_0 = arith.constant 0 : i32
    return %c0_i32, %arg0 : i32, i32
  }
}

module attributes {stable_mosaic.version = 11 : i64} {
  func.func @_generator_kernel(%arg0: i32, %arg1: memref<16x128xbf16, #tpu.memory_space<vmem>>, %arg2: memref<128x16xbf16, #tpu.memory_space<vmem>>, %arg3: memref<128x1xf32, #tpu.memory_space<vmem>>, %arg4: memref<128x128xbf16, #tpu.memory_space<vmem>>, %arg5: memref<128x1xf32, #tpu.memory_space<vmem>>, %arg6: memref<128x128xbf16, #tpu.memory_space<vmem>>, %arg7: memref<128x1xf32, #tpu.memory_space<vmem>>, %arg8: memref<2x128xbf16, #tpu.memory_space<vmem>>, %arg9: memref<2x1xf32, #tpu.memory_space<vmem>>, %arg10: memref<2x128xf32, #tpu.memory_space<vmem>>) attributes {dimension_semantics = [#tpu.dimension_semantics<parallel>], iteration_bounds = array<i64: 1>, scalar_prefetch = 0 : i64, scratch_operands = 0 : i64, tpu.core_type = #tpu.core_type<tc>, window_params = [{transform_indices = @transform_0, window_bounds = array<i64: 16, 128>}, {pipeline_mode = #tpu.pipeline_mode<synchronous>, transform_indices = @transform_1, window_bounds = array<i64: 128, 16>}, {pipeline_mode = #tpu.pipeline_mode<synchronous>, transform_indices = @transform_2, window_bounds = array<i64: 128, 1>}, {pipeline_mode = #tpu.pipeline_mode<synchronous>, transform_indices = @transform_3, window_bounds = array<i64: 128, 128>}, {pipeline_mode = #tpu.pipeline_mode<synchronous>, transform_indices = @transform_4, window_bounds = array<i64: 128, 1>}, {pipeline_mode = #tpu.pipeline_mode<synchronous>, transform_indices = @transform_5, window_bounds = array<i64: 128, 128>}, {pipeline_mode = #tpu.pipeline_mode<synchronous>, transform_indices = @transform_6, window_bounds = array<i64: 128, 1>}, {pipeline_mode = #tpu.pipeline_mode<synchronous>, transform_indices = @transform_7, window_bounds = array<i64: 2, 128>}, {pipeline_mode = #tpu.pipeline_mode<synchronous>, transform_indices = @transform_8, window_bounds = array<i64: 2, 1>}, {transform_indices = @transform_9, window_bounds = array<i64: 2, 128>}]} {
    %c0 = arith.constant 0 : index
    %c0_0 = arith.constant 0 : index
    %0 = vector.load %arg2[%c0, %c0_0] : memref<128x16xbf16, #tpu.memory_space<vmem>>, vector<128x16xbf16>
    %c0_1 = arith.constant 0 : index
    %c0_2 = arith.constant 0 : index
    %1 = vector.load %arg1[%c0_1, %c0_2] : memref<16x128xbf16, #tpu.memory_space<vmem>>, vector<16x128xbf16>
    %cst = arith.constant dense<0.000000e+00> : vector<128x128xf32>
    %2 = tpu.matmul %0, %1, %cst {dimension_numbers = #tpu.dot_dimension_numbers<[1], [0], [0], [1], [0, 0, 1, 1], [], []>} : vector<128x16xbf16>, vector<16x128xbf16>, vector<128x128xf32> -> vector<128x128xf32>
    %c0_3 = arith.constant 0 : index
    %c0_4 = arith.constant 0 : index
    %3 = vector.load %arg3[%c0_3, %c0_4] : memref<128x1xf32, #tpu.memory_space<vmem>>, vector<128x1xf32>
    %4 = vector.broadcast %3 : vector<128x1xf32> to vector<128x128xf32>
    %5 = arith.addf %2, %4 : vector<128x128xf32>
    %cst_5 = arith.constant 0.000000e+00 : f32
    %6 = vector.broadcast %cst_5 : f32 to vector<128x128xf32>
    %7 = arith.maximumf %5, %6 : vector<128x128xf32>
    %c0_6 = arith.constant 0 : index
    %c0_7 = arith.constant 0 : index
    %8 = vector.load %arg4[%c0_6, %c0_7] : memref<128x128xbf16, #tpu.memory_space<vmem>>, vector<128x128xbf16>
    %9 = arith.truncf %7 : vector<128x128xf32> to vector<128x128xbf16>
    %cst_8 = arith.constant dense<0.000000e+00> : vector<128x128xf32>
    %10 = tpu.matmul %8, %9, %cst_8 {dimension_numbers = #tpu.dot_dimension_numbers<[1], [0], [0], [1], [0, 0, 1, 1], [], []>} : vector<128x128xbf16>, vector<128x128xbf16>, vector<128x128xf32> -> vector<128x128xf32>
    %c0_9 = arith.constant 0 : index
    %c0_10 = arith.constant 0 : index
    %11 = vector.load %arg5[%c0_9, %c0_10] : memref<128x1xf32, #tpu.memory_space<vmem>>, vector<128x1xf32>
    %12 = vector.broadcast %11 : vector<128x1xf32> to vector<128x128xf32>
    %13 = arith.addf %10, %12 : vector<128x128xf32>
    %cst_11 = arith.constant 0.000000e+00 : f32
    %14 = vector.broadcast %cst_11 : f32 to vector<128x128xf32>
    %15 = arith.maximumf %13, %14 : vector<128x128xf32>
    %c0_12 = arith.constant 0 : index
    %c0_13 = arith.constant 0 : index
    %16 = vector.load %arg6[%c0_12, %c0_13] : memref<128x128xbf16, #tpu.memory_space<vmem>>, vector<128x128xbf16>
    %17 = arith.truncf %15 : vector<128x128xf32> to vector<128x128xbf16>
    %cst_14 = arith.constant dense<0.000000e+00> : vector<128x128xf32>
    %18 = tpu.matmul %16, %17, %cst_14 {dimension_numbers = #tpu.dot_dimension_numbers<[1], [0], [0], [1], [0, 0, 1, 1], [], []>} : vector<128x128xbf16>, vector<128x128xbf16>, vector<128x128xf32> -> vector<128x128xf32>
    %c0_15 = arith.constant 0 : index
    %c0_16 = arith.constant 0 : index
    %19 = vector.load %arg7[%c0_15, %c0_16] : memref<128x1xf32, #tpu.memory_space<vmem>>, vector<128x1xf32>
    %20 = vector.broadcast %19 : vector<128x1xf32> to vector<128x128xf32>
    %21 = arith.addf %18, %20 : vector<128x128xf32>
    %cst_17 = arith.constant 0.000000e+00 : f32
    %22 = vector.broadcast %cst_17 : f32 to vector<128x128xf32>
    %23 = arith.maximumf %21, %22 : vector<128x128xf32>
    %c0_18 = arith.constant 0 : index
    %c0_19 = arith.constant 0 : index
    %24 = vector.load %arg8[%c0_18, %c0_19] : memref<2x128xbf16, #tpu.memory_space<vmem>>, vector<2x128xbf16>
    %25 = arith.truncf %23 : vector<128x128xf32> to vector<128x128xbf16>
    %cst_20 = arith.constant dense<0.000000e+00> : vector<2x128xf32>
    %26 = tpu.matmul %24, %25, %cst_20 {dimension_numbers = #tpu.dot_dimension_numbers<[1], [0], [0], [1], [0, 0, 1, 1], [], []>} : vector<2x128xbf16>, vector<128x128xbf16>, vector<2x128xf32> -> vector<2x128xf32>
    %c0_21 = arith.constant 0 : index
    %c0_22 = arith.constant 0 : index
    %27 = vector.load %arg9[%c0_21, %c0_22] : memref<2x1xf32, #tpu.memory_space<vmem>>, vector<2x1xf32>
    %28 = vector.broadcast %27 : vector<2x1xf32> to vector<2x128xf32>
    %29 = arith.addf %26, %28 : vector<2x128xf32>
    %cst_23 = arith.constant 0.000000e+00 : f32
    %30 = vector.broadcast %cst_23 : f32 to vector<2x128xf32>
    %31 = arith.maximumf %29, %30 : vector<2x128xf32>
    %c0_24 = arith.constant 0 : index
    %c0_25 = arith.constant 0 : index
    %32 = vector.load %arg10[%c0_24, %c0_25] : memref<2x128xf32, #tpu.memory_space<vmem>>, vector<2x128xf32>
    tpu.vector_store %arg10[%c0_24, %c0_25], %31 {strides = array<i32>} : memref<2x128xf32, #tpu.memory_space<vmem>>, vector<2x128xf32>,
    return
  }
  func.func @transform_0(%arg0: i32) -> (i32, i32) {
    %c0_i32 = arith.constant 0 : i32
    %c0_i32_0 = arith.constant 0 : i32
    return %c0_i32, %arg0 : i32, i32
  }
  func.func @transform_1(%arg0: i32) -> (i32, i32) {
    %c0_i32 = arith.constant 0 : i32
    %c0_i32_0 = arith.constant 0 : i32
    %c0_i32_1 = arith.constant 0 : i32
    return %c0_i32, %c0_i32_0 : i32, i32
  }
  func.func @transform_2(%arg0: i32) -> (i32, i32) {
    %c0_i32 = arith.constant 0 : i32
    %c0_i32_0 = arith.constant 0 : i32
    %c0_i32_1 = arith.constant 0 : i32
    return %c0_i32, %c0_i32_0 : i32, i32
  }
  func.func @transform_3(%arg0: i32) -> (i32, i32) {
    %c0_i32 = arith.constant 0 : i32
    %c0_i32_0 = arith.constant 0 : i32
    %c0_i32_1 = arith.constant 0 : i32
    return %c0_i32, %c0_i32_0 : i32, i32
  }
  func.func @transform_4(%arg0: i32) -> (i32, i32) {
    %c0_i32 = arith.constant 0 : i32
    %c0_i32_0 = arith.constant 0 : i32
    %c0_i32_1 = arith.constant 0 : i32
    return %c0_i32, %c0_i32_0 : i32, i32
  }
  func.func @transform_5(%arg0: i32) -> (i32, i32) {
    %c0_i32 = arith.constant 0 : i32
    %c0_i32_0 = arith.constant 0 : i32
    %c0_i32_1 = arith.constant 0 : i32
    return %c0_i32, %c0_i32_0 : i32, i32
  }
  func.func @transform_6(%arg0: i32) -> (i32, i32) {
    %c0_i32 = arith.constant 0 : i32
    %c0_i32_0 = arith.constant 0 : i32
    %c0_i32_1 = arith.constant 0 : i32
    return %c0_i32, %c0_i32_0 : i32, i32
  }
  func.func @transform_7(%arg0: i32) -> (i32, i32) {
    %c0_i32 = arith.constant 0 : i32
    %c0_i32_0 = arith.constant 0 : i32
    %c0_i32_1 = arith.constant 0 : i32
    return %c0_i32, %c0_i32_0 : i32, i32
  }
  func.func @transform_8(%arg0: i32) -> (i32, i32) {
    %c0_i32 = arith.constant 0 : i32
    %c0_i32_0 = arith.constant 0 : i32
    %c0_i32_1 = arith.constant 0 : i32
    return %c0_i32, %c0_i32_0 : i32, i32
  }
  func.func @transform_9(%arg0: i32) -> (i32, i32) {
    %c0_i32 = arith.constant 0 : i32
    %c0_i32_0 = arith.constant 0 : i32
    return %c0_i32, %arg0 : i32, i32
  }
}

</mosaic_0001>

<bundles_post_ra>
// kernel: tpu_custom_call.1
= control target key start
LH: loop header
LB: loop body
LE: loop exit
PB: predicated region body
PF: predicated region fallthrough
CT: control target
= control target key end

     0   :  { %v976_v2 = vmov 0   ;;  %vm194_vm0 = vcmask 130048   ;;  %s1271_s0 = inlined_call_operand.vmem [shape: bf16[16,128], index: 0, kind: input, shape index: {}]   ;;  %s1272_s1 = inlined_call_operand.vmem [shape: bf16[128,16], index: 1, kind: input, shape index: {}]   ;;  %s1273_s2 = inlined_call_operand.vmem [shape: f32[128,1], index: 2, kind: input, shape index: {}]   ;;  %s1274_s3 = inlined_call_operand.vmem [shape: bf16[128,128], index: 3, kind: input, shape index: {}]   ;;  %s1275_s4 = inlined_call_operand.vmem [shape: f32[128,1], index: 4, kind: input, shape index: {}]   ;;  %s1276_s5 = inlined_call_operand.vmem [shape: bf16[128,128], index: 5, kind: input, shape index: {}]   ;;  %s1277_s6 = inlined_call_operand.vmem [shape: f32[128,1], index: 6, kind: input, shape index: {}]   ;;  %s1278_s7 = inlined_call_operand.vmem [shape: bf16[2,128], index: 7, kind: input, shape index: {}]   ;;  %s1279_s8 = inlined_call_operand.vmem [shape: f32[2,1], index: 8, kind: input, shape index: {}]   ;;  %s1280_s9 = inlined_call_operand.hbm [shape: f32[2,128], index: 9, kind: output, shape index: {}]  }
   0x1   :  { %v66_v0 = vld [vmem:[%s1273_s2 + $0x70] sm:$0xff]  ;;  %v912_v1 = vld [vmem:[%s1271_s0] sm:$0xff]  ;;  %947 = vset.pattern.permute.xlu0 %v976_v2  ;;  %949 = vset.pattern.permute.xlu2 %v976_v2 }
   0x2   :  { %v904_v3 = vld [vmem:[%s1272_s1] sm:$0xff]  ;;  %v62_v5 = vld [vmem:[%s1273_s2 + $0x50] sm:$0xff]  ;;  %140 = vperm.xlu0 %947, %v66_v0   ;;  %226 = vmatpush.bf16.msra.mxu0 %v912_v1 }
   0x3   :  { %v64_v4 = vld [vmem:[%s1273_s2 + $0x60] sm:$0xff]  ;;  %948 = vset.pattern.permute.xlu1 %v976_v2  ;;  %120 = vperm.xlu2 %949, %v62_v5  }
   0x4   :  { %130 = vperm.xlu1 %948, %v64_v4  }
   0x5   :  { %832 = vmatmul.msk.bf16.vlgmr.msra.gmra.mxu0 %vm194_vm0, %v904_v3 }
   0x6   :  { %14 = vsyncpa [#allocation3], 0  ;;  %v67_v6 = vld [vmem:[%s1273_s2 + $0x78] sm:$0xff]  ;;  %v65_v8 = vld [vmem:[%s1273_s2 + $0x68] sm:$0xff]  ;;  %s977_s12 = smov [#allocation2]   ;;  %s787_s15 = sshll.u32 %s1280_s9, 4  ;;  %s788_s15 = int_to_ptr.hbm [resolvable:$true] %s787_s15 }
   0x7   :  { %v63_v7 = vld [vmem:[%s1273_s2 + $0x58] sm:$0xff]  ;;  %v60_v9 = vld [vmem:[%s1273_s2 + $0x40] sm:$0xff]  ;;  %v58_v10 = vld [vmem:[%s1273_s2 + $0x30] sm:$0xff] }
   0x8   :  { %v905_v11 = vld [vmem:[%s1272_s1 + $0x8] sm:$0xff]  ;;  %v59_v13 = vld [vmem:[%s1273_s2 + $0x38] sm:$0xff]  ;;  %v56_v15 = vld [vmem:[%s1273_s2 + $0x20] sm:$0xff] }
   0x9   :  { %v61_v12 = vld [vmem:[%s1273_s2 + $0x48] sm:$0xff]  ;;  %v54_v16 = vld [vmem:[%s1273_s2 + $0x10] sm:$0xff]  ;;  %v52_v17 = vld [vmem:[%s1273_s2] sm:$0xff] }
   0xa   :  { %145 = vperm.xlu0 %947, %v67_v6   ;;  %v57_v14 = vld [vmem:[%s1273_s2 + $0x28] sm:$0xff]  ;;  %v906_v18 = vld [vmem:[%s1272_s1 + $0x10] sm:$0xff]  ;;  %v55_v19 = vld [vmem:[%s1273_s2 + $0x18] sm:$0xff] }
   0xb   :  { %125 = vperm.xlu2 %949, %v63_v7   ;;  %v53_v20 = vld [vmem:[%s1273_s2 + $0x8] sm:$0xff]  ;;  %v322_v21 = vld [vmem:[%s1275_s4 + $0x70] sm:$0xff]  ;;  %v323_v22 = vld [vmem:[%s1275_s4 + $0x78] sm:$0xff]  ;;  %s785_s2 = sshll.u32 %s977_s12, 4  ;;  %s786_s2 = int_to_ptr.vmem [resolvable:$true] %s785_s2 }
   0xc   :  { %135 = vperm.xlu1 %948, %v65_v8   ;;  %v320_v23 = vld [vmem:[%s1275_s4 + $0x60] sm:$0xff]  ;;  %v907_v24 = vld [vmem:[%s1272_s1 + $0x18] sm:$0xff]  ;;  %v321_v25 = vld [vmem:[%s1275_s4 + $0x68] sm:$0xff] }
   0xd   :  { %v318_v26 = vld [vmem:[%s1275_s4 + $0x50] sm:$0xff]  ;;  %v319_v27 = vld [vmem:[%s1275_s4 + $0x58] sm:$0xff]  ;;  %v316_v28 = vld [vmem:[%s1275_s4 + $0x40] sm:$0xff] }
   0xe   :  { %v317_v29 = vld [vmem:[%s1275_s4 + $0x48] sm:$0xff]  ;;  %v314_v30 = vld [vmem:[%s1275_s4 + $0x30] sm:$0xff]  ;;  %v908_v31 = vld [vmem:[%s1272_s1 + $0x20] sm:$0xff] }
   0xf   :  { %v315_v32 = vld [vmem:[%s1275_s4 + $0x38] sm:$0xff]  ;;  %v312_v33 = vld [vmem:[%s1275_s4 + $0x20] sm:$0xff]  ;;  %v313_v34 = vld [vmem:[%s1275_s4 + $0x28] sm:$0xff] }
  0x10   :  { %v310_v35 = vld [vmem:[%s1275_s4 + $0x10] sm:$0xff]  ;;  %v311_v36 = vld [vmem:[%s1275_s4 + $0x18] sm:$0xff]  ;;  %v308_v37 = vld [vmem:[%s1275_s4] sm:$0xff] }
  0x11   :  { %v909_v38 = vld [vmem:[%s1272_s1 + $0x28] sm:$0xff]  ;;  %v555_v40 = vld [vmem:[%s1277_s6 + $0x70] sm:$0xff]  ;;  %v556_v41 = vld [vmem:[%s1277_s6 + $0x78] sm:$0xff] }
  0x12   :  { %110 = vperm.xlu0 %947, %v60_v9   ;;  %v309_v39 = vld [vmem:[%s1275_s4 + $0x8] sm:$0xff]  ;;  %v553_v42 = vld [vmem:[%s1277_s6 + $0x60] sm:$0xff]  ;;  %v551_v44 = vld [vmem:[%s1277_s6 + $0x50] sm:$0xff] }
  0x13   :  { %100 = vperm.xlu2 %949, %v58_v10   ;;  %v554_v43 = vld [vmem:[%s1277_s6 + $0x68] sm:$0xff]  ;;  %v910_v45 = vld [vmem:[%s1272_s1 + $0x30] sm:$0xff]  ;;  %v552_v46 = vld [vmem:[%s1277_s6 + $0x58] sm:$0xff] }
  0x14   :  { %115 = vperm.xlu1 %948, %v61_v12   ;;  %v549_v47 = vld [vmem:[%s1277_s6 + $0x40] sm:$0xff]  ;;  %v550_v48 = vld [vmem:[%s1277_s6 + $0x48] sm:$0xff]  ;;  %v547_v49 = vld [vmem:[%s1277_s6 + $0x30] sm:$0xff] }
  0x15   :  { %833 = vmatmul.msk.bf16.gmra.mxu0 %vm194_vm0, %v905_v11  ;;  %v548_v50 = vld [vmem:[%s1277_s6 + $0x38] sm:$0xff]  ;;  %v545_v51 = vld [vmem:[%s1277_s6 + $0x20] sm:$0xff]  ;;  %v546_v54 = vld [vmem:[%s1277_s6 + $0x28] sm:$0xff] }
  0x16   :  { %v911_v53 = vld [vmem:[%s1272_s1 + $0x38] sm:$0xff]  ;;  %v543_v55 = vld [vmem:[%s1277_s6 + $0x10] sm:$0xff]  ;;  %v541_v59 = vld [vmem:[%s1277_s6] sm:$0xff] }
  0x17   :  { %v544_v58 = vld [vmem:[%s1277_s6 + $0x18] sm:$0xff]  ;;  %v542_v61 = vld [vmem:[%s1277_s6 + $0x8] sm:$0xff]  ;;  %v759_v0 = vld [vmem:[%s1279_s8] sm:$0x3] }
  0x1a   :  { %105 = vperm.xlu0 %947, %v59_v13  }
  0x1b   :  { %95 = vperm.xlu2 %949, %v57_v14  }
  0x1c   :  { %90 = vperm.xlu1 %948, %v56_v15  }
  0x22   :  { %80 = vperm.xlu0 %947, %v54_v16  }
  0x23   :  { %70 = vperm.xlu2 %949, %v52_v17  }
  0x24   :  { %85 = vperm.xlu1 %948, %v55_v19  }
  0x25   :  { %834 = vmatmul.msk.bf16.gmra.mxu0 %vm194_vm0, %v906_v18 }
  0x2a   :  { %75 = vperm.xlu0 %947, %v53_v20  }
  0x2b   :  { %401 = vperm.xlu2 %949, %v323_v22  }
  0x2c   :  { %396 = vperm.xlu1 %948, %v322_v21  }
  0x32   :  { %386 = vperm.xlu0 %947, %v320_v23  }
  0x33   :  { %376 = vperm.xlu2 %949, %v318_v26  }
  0x34   :  { %391 = vperm.xlu1 %948, %v321_v25  }
  0x35   :  { %835 = vmatmul.msk.bf16.gmra.mxu0 %vm194_vm0, %v907_v24 }
  0x3a   :  { %381 = vperm.xlu0 %947, %v319_v27  }
  0x3b   :  { %371 = vperm.xlu2 %949, %v317_v29  }
  0x3c   :  { %366 = vperm.xlu1 %948, %v316_v28  }
  0x42   :  { %356 = vperm.xlu0 %947, %v314_v30  }
  0x43   :  { %346 = vperm.xlu2 %949, %v312_v33  }
  0x44   :  { %361 = vperm.xlu1 %948, %v315_v32  }
  0x45   :  { %836 = vmatmul.msk.bf16.gmra.mxu0 %vm194_vm0, %v908_v31 }
  0x4a   :  { %351 = vperm.xlu0 %947, %v313_v34  }
  0x4b   :  { %341 = vperm.xlu2 %949, %v311_v36  }
  0x4c   :  { %336 = vperm.xlu1 %948, %v310_v35  }
  0x52   :  { %326 = vperm.xlu0 %947, %v308_v37  }
  0x53   :  { %629 = vperm.xlu2 %949, %v555_v40  }
  0x54   :  { %331 = vperm.xlu1 %948, %v309_v39  }
  0x55   :  { %837 = vmatmul.msk.bf16.gmra.mxu0 %vm194_vm0, %v909_v38 }
  0x5a   :  { %634 = vperm.xlu0 %947, %v556_v41  }
  0x5b   :  { %624 = vperm.xlu2 %949, %v554_v43  }
  0x5c   :  { %619 = vperm.xlu1 %948, %v553_v42  }
  0x5d   :  { %v1188_v52 = vpop.permute.xlu2 %120 }
  0x62   :  { %609 = vperm.xlu0 %947, %v551_v44  }
  0x63   :  { %599 = vperm.xlu2 %949, %v549_v47  }
  0x64   :  { %614 = vperm.xlu1 %948, %v552_v46  }
  0x65   :  { %838 = vmatmul.msk.bf16.gmra.mxu0 %vm194_vm0, %v910_v45  ;;  %v126_v60 = vpop.permute.xlu2 %125 }
  0x6a   :  { %604 = vperm.xlu0 %947, %v550_v48  }
  0x6b   :  { %594 = vperm.xlu2 %949, %v548_v50  }
  0x6c   :  { %589 = vperm.xlu1 %948, %v547_v49  }
  0x6d   :  { %v101_v2 = vpop.permute.xlu2 %100 }
  0x72   :  { %579 = vperm.xlu0 %947, %v545_v51  }
  0x73   :  { %569 = vperm.xlu2 %949, %v543_v55  }
  0x74   :  { %v141_v56 = vpop.permute.xlu0 %140  ;;  %584 = vperm.xlu1 %948, %v546_v54  }
  0x75   :  { %839 = vmatmul.msk.bf16.gmra.mxu0 %vm194_vm0, %v911_v53  ;;  %v96_v7 = vpop.permute.xlu2 %95 }
  0x76   :  { %v131_v57 = vpop.permute.xlu1 %130 }
  0x7a   :  { %574 = vperm.xlu0 %947, %v544_v58  }
  0x7b   :  { %564 = vperm.xlu2 %949, %v542_v61  }
  0x7c   :  { %v146_v62 = vpop.permute.xlu0 %145  ;;  %559 = vperm.xlu1 %948, %v541_v59  }
  0x7d   :  { %v71_v11 = vpop.permute.xlu2 %70 }
  0x7e   :  { %v136_v63 = vpop.permute.xlu1 %135 }
  0x82   :  { %762 = vperm.xlu0 %947, %v759_v0   ;;  %v228_v1 = vpop.f32.mrf.mxu0 }
  0x83   :  { %v229_v15 = vadd.f32 %v228_v1, %v71_v11 }
  0x84   :  { %v111_v3 = vpop.permute.xlu0 %110 }
  0x85   :  { %v268_v21 = vmax.f32 %v229_v15, 0.0 }
  0x86   :  { %v116_v4 = vpop.permute.xlu1 %115 }
  0x8a   :  { %v230_v5 = vpop.f32.mrf.mxu0 }
  0x8c   :  { %v106_v6 = vpop.permute.xlu0 %105 }
  0x8e   :  { %v91_v8 = vpop.permute.xlu1 %90 }
  0x92   :  { %v233_v9 = vpop.f32.mrf.mxu0 }
  0x94   :  { %v81_v10 = vpop.permute.xlu0 %80 }
  0x95   :  { %v234_v13 = vadd.f32 %v233_v9, %v81_v10  ;;  %v917_v9 = vld [vmem:[%s1274_s3 + $0x20] sm:$0xff]  ;;  %v918_v10 = vld [vmem:[%s1274_s3 + $0x28] sm:$0xff] }
  0x96   :  { %v86_v12 = vpop.permute.xlu1 %85 }
  0x97   :  { %v270_v18 = vmax.f32 %v234_v13, 0.0 }
  0x9a   :  { %v235_v14 = vpop.f32.mrf.mxu0 }
  0x9b   :  { %v236_v16 = vadd.f32 %v235_v14, %v86_v12 }
  0x9c   :  { %v76_v17 = vpop.permute.xlu0 %75 }
  0x9d   :  { %v271_v19 = vmax.f32 %v236_v16, 0.0  ;;  %v231_v20 = vadd.f32 %v230_v5, %v76_v17  ;;  %v402_v16 = vpop.permute.xlu2 %401 }
  0x9e   :  { %v397_v11 = vpop.permute.xlu1 %396 }
  0x9f   :  { %v269_v22 = vmax.f32 %v231_v20, 0.0  ;;  %v301_v23 = vpack.c.bf16 %v271_v19, %v270_v18 }
  0xa1   :  { %v300_v24 = vpack.c.bf16 %v269_v22, %v268_v21 }
  0xa2   :  { %v238_v25 = vpop.f32.mrf.mxu0 }
  0xa3   :  { %v239_v26 = vadd.f32 %v238_v25, %v91_v8  ;;  %v916_v8 = vld [vmem:[%s1274_s3 + $0x18] sm:$0xff] }
  0xa4   :  { %v387_v12 = vpop.permute.xlu0 %386 }
  0xa5   :  { %v272_v29 = vmax.f32 %v239_v26, 0.0  ;;  %v377_v19 = vpop.permute.xlu2 %376 }
  0xa6   :  { %v392_v13 = vpop.permute.xlu1 %391 }
  0xaa   :  { %v240_v27 = vpop.f32.mrf.mxu0 }
  0xab   :  { %v241_v28 = vadd.f32 %v240_v27, %v96_v7  ;;  %v915_v7 = vld [vmem:[%s1274_s3 + $0x10] sm:$0xff] }
  0xac   :  { %v382_v14 = vpop.permute.xlu0 %381 }
  0xad   :  { %v273_v30 = vmax.f32 %v241_v28, 0.0 }
  0xae   :  { %v367_v15 = vpop.permute.xlu1 %366 }
  0xaf   :  { %v302_v31 = vpack.c.bf16 %v273_v30, %v272_v29 }
  0xb2   :  { %v243_v32 = vpop.f32.mrf.mxu0 }
  0xb3   :  { %v244_v33 = vadd.f32 %v243_v32, %v101_v2 }
  0xb4   :  { %v357_v17 = vpop.permute.xlu0 %356 }
  0xb5   :  { %v274_v36 = vmax.f32 %v244_v33, 0.0 }
  0xb6   :  { %v362_v18 = vpop.permute.xlu1 %361 }
  0xba   :  { %v245_v34 = vpop.f32.mrf.mxu0 }
  0xbb   :  { %v246_v35 = vadd.f32 %v245_v34, %v106_v6 }
  0xbc   :  { %v352_v20 = vpop.permute.xlu0 %351 }
  0xbd   :  { %v275_v37 = vmax.f32 %v246_v35, 0.0 }
  0xbe   :  { %v337_v21 = vpop.permute.xlu1 %336 }
  0xbf   :  { %v303_v38 = vpack.c.bf16 %v275_v37, %v274_v36 }
  0xc2   :  { %v248_v39 = vpop.f32.mrf.mxu0 }
  0xc3   :  { %v249_v5 = vadd.f32 %v248_v39, %v111_v3  ;;  %v914_v3 = vld [vmem:[%s1274_s3 + $0x8] sm:$0xff] }
  0xc6   :  { %v332_v27 = vpop.permute.xlu1 %331 }
  0xca   :  { %v250_v40 = vpop.f32.mrf.mxu0 }
  0xcb   :  { %v251_v0 = vadd.f32 %v250_v40, %v116_v4  ;;  %v920_v4 = vld [vmem:[%s1274_s3 + $0x38] sm:$0xff] }
  0xd2   :  { %v253_v41 = vpop.f32.mrf.mxu0 }
  0xd3   :  { %v254_v59 = vadd.f32 %v253_v41, %v1188_v52  ;;  %v913_v52 = vld [vmem:[%s1274_s3] sm:$0xff] }
  0xd5   :  { %v278_v6 = vmax.f32 %v254_v59, 0.0 }
  0xda   :  { %v255_v42 = vpop.f32.mrf.mxu0 }
  0xdb   :  { %v256_v54 = vadd.f32 %v255_v42, %v126_v60 }
  0xdd   :  { %v279_v1 = vmax.f32 %v256_v54, 0.0 }
  0xe2   :  { %v258_v43 = vpop.f32.mrf.mxu0 }
  0xe3   :  { %v259_v50 = vadd.f32 %v258_v43, %v131_v57  ;;  %v276_v57 = vmax.f32 %v249_v5, 0.0 }
  0xe5   :  { %v280_v61 = vmax.f32 %v259_v50, 0.0 }
  0xea   :  { %v260_v44 = vpop.f32.mrf.mxu0 }
  0xeb   :  { %v261_v48 = vadd.f32 %v260_v44, %v136_v63  ;;  %v919_v63 = vld [vmem:[%s1274_s3 + $0x30] sm:$0xff] }
  0xed   :  { %v281_v55 = vmax.f32 %v261_v48, 0.0 }
  0xef   :  { %v306_v2 = vpack.c.bf16 %v281_v55, %v280_v61 }
  0xf2   :  { %v263_v45 = vpop.f32.mrf.mxu0 }
  0xf3   :  { %v264_v46 = vadd.f32 %v263_v45, %v141_v56  ;;  %v277_v56 = vmax.f32 %v251_v0, 0.0 }
  0xf5   :  { %v282_v51 = vmax.f32 %v264_v46, 0.0  ;;  %v304_v60 = vpack.c.bf16 %v277_v56, %v276_v57 }
  0xfa   :  { %v265_v47 = vpop.f32.mrf.mxu0 }
  0xfb   :  { %v266_v49 = vadd.f32 %v265_v47, %v146_v62  ;;  %v305_v62 = vpack.c.bf16 %v279_v1, %v278_v6 }
  0xfd   :  { %v283_v53 = vmax.f32 %v266_v49, 0.0 }
  0xff   :  { %v307_v58 = vpack.c.bf16 %v283_v53, %v282_v51 }
 0x101   :  { %452 = vmatpush.bf16.msra.mxu1 %v307_v58  ;;  %929 = vmatpush.bf16.msra.mxu3 %v307_v58 }
 0x105   :  { %453 = vmatpush.bf16.msra.mxu1 %v306_v2  ;;  %930 = vmatpush.bf16.msra.mxu3 %v306_v2 }
 0x109   :  { %454 = vmatpush.bf16.msra.mxu1 %v305_v62  ;;  %931 = vmatpush.bf16.msra.mxu3 %v305_v62 }
 0x10d   :  { %455 = vmatpush.bf16.msra.mxu1 %v304_v60  ;;  %932 = vmatpush.bf16.msra.mxu3 %v304_v60 }
 0x111   :  { %456 = vmatpush.bf16.msra.mxu1 %v303_v38  ;;  %933 = vmatpush.bf16.msra.mxu3 %v303_v38 }
 0x115   :  { %457 = vmatpush.bf16.msra.mxu1 %v302_v31  ;;  %934 = vmatpush.bf16.msra.mxu3 %v302_v31 }
 0x119   :  { %458 = vmatpush.bf16.msra.mxu1 %v301_v23  ;;  %935 = vmatpush.bf16.msra.mxu3 %v301_v23  ;;  %v372_v23 = vpop.permute.xlu2 %371 }
 0x11d   :  { %459 = vmatpush.bf16.msra.mxu1 %v300_v24  ;;  %936 = vmatpush.bf16.msra.mxu3 %v300_v24  ;;  %v327_v24 = vpop.permute.xlu0 %326 }
 0x120   :  { %460 = vmatmul.bf16.vlgmr.msra.gmra.mxu1 %v913_v52  ;;  %490 = vmatmul.bf16.vlgmr.msra.gmra.mxu3 %v919_v63 }
 0x121   :  { %v347_v33 = vpop.permute.xlu2 %346 }
 0x129   :  { %v342_v38 = vpop.permute.xlu2 %341 }
 0x130   :  { %465 = vmatmul.bf16.gmra.mxu1 %v914_v3  ;;  %495 = vmatmul.bf16.gmra.mxu3 %v920_v4 }
 0x140   :  { %470 = vmatmul.bf16.gmra.mxu1 %v915_v7 }
 0x150   :  { %475 = vmatmul.bf16.gmra.mxu1 %v916_v8 }
 0x160   :  { %480 = vmatmul.bf16.gmra.mxu1 %v917_v9 }
 0x170   :  { %485 = vmatmul.bf16.gmra.mxu1 %v918_v10 }
 0x19d   :  { %v461_v22 = vpop.f32.mrf.mxu1 }
 0x19e   :  { %v462_v26 = vadd.f32 %v461_v22, %v327_v24  ;;  %v928_v22 = vld [vmem:[%s1276_s5 + $0x38] sm:$0xff] }
 0x19f   :  { %v924_v24 = vld [vmem:[%s1276_s5 + $0x18] sm:$0xff] }
 0x1a0   :  { %v501_v30 = vmax.f32 %v462_v26, 0.0  ;;  %v926_v26 = vld [vmem:[%s1276_s5 + $0x28] sm:$0xff] }
 0x1a3   :  { %v491_v25 = vpop.f32.mrf.mxu3 }
 0x1a4   :  { %v492_v49 = vadd.f32 %v491_v25, %v387_v12  ;;  %v925_v25 = vld [vmem:[%s1276_s5 + $0x20] sm:$0xff] }
 0x1a5   :  { %v463_v28 = vpop.f32.mrf.mxu1 }
 0x1a6   :  { %v464_v29 = vadd.f32 %v463_v28, %v332_v27  ;;  %v513_v55 = vmax.f32 %v492_v49, 0.0  ;;  %v630_v27 = vpop.permute.xlu2 %629  ;;  %v620_v28 = vpop.permute.xlu1 %619 }
 0x1a8   :  { %v502_v31 = vmax.f32 %v464_v29, 0.0 }
 0x1aa   :  { %v1237_v32 = vpack.c.bf16 %v502_v31, %v501_v30 }
 0x1ab   :  { %v493_v34 = vpop.f32.mrf.mxu3 }
 0x1ac   :  { %v494_v46 = vadd.f32 %v493_v34, %v392_v13 }
 0x1ad   :  { %v466_v35 = vpop.f32.mrf.mxu1 }
 0x1ae   :  { %v467_v37 = vadd.f32 %v466_v35, %v337_v21  ;;  %v514_v53 = vmax.f32 %v494_v46, 0.0  ;;  %v625_v29 = vpop.permute.xlu2 %624  ;;  %v615_v30 = vpop.permute.xlu1 %614 }
 0x1b0   :  { %v503_v41 = vmax.f32 %v467_v37, 0.0  ;;  %v539_v58 = vpack.c.bf16 %v514_v53, %v513_v55 }
 0x1b3   :  { %v496_v36 = vpop.f32.mrf.mxu3 }
 0x1b4   :  { %v497_v43 = vadd.f32 %v496_v36, %v397_v11 }
 0x1b5   :  { %v468_v39 = vpop.f32.mrf.mxu1 }
 0x1b6   :  { %v469_v40 = vadd.f32 %v468_v39, %v342_v38  ;;  %v515_v50 = vmax.f32 %v497_v43, 0.0  ;;  %v600_v31 = vpop.permute.xlu2 %599 }
 0x1b8   :  { %v504_v42 = vmax.f32 %v469_v40, 0.0 }
 0x1ba   :  { %v534_v44 = vpack.c.bf16 %v504_v42, %v503_v41 }
 0x1bb   :  { %v498_v45 = vpop.f32.mrf.mxu3 }
 0x1bc   :  { %v499_v47 = vadd.f32 %v498_v45, %v402_v16 }
 0x1bd   :  { %v471_v48 = vpop.f32.mrf.mxu1 }
 0x1be   :  { %v516_v51 = vmax.f32 %v499_v47, 0.0  ;;  %v472_v13 = vadd.f32 %v471_v48, %v347_v33  ;;  %v590_v33 = vpop.permute.xlu1 %589  ;;  %v595_v34 = vpop.permute.xlu2 %594 }
 0x1c0   :  { %v540_v54 = vpack.c.bf16 %v516_v51, %v515_v50 }
 0x1c2   :  { %685 = vmatpush.bf16.msra.mxu2 %v540_v54  ;;  %937 = vmatpush.bf16.msrb.mxu3 %v540_v54 }
 0x1c5   :  { %v473_v59 = vpop.f32.mrf.mxu1 }
 0x1c6   :  { %686 = vmatpush.bf16.msra.mxu2 %v539_v58  ;;  %938 = vmatpush.bf16.msrb.mxu3 %v539_v58  ;;  %v474_v10 = vadd.f32 %v473_v59, %v352_v20  ;;  %v922_v20 = vld [vmem:[%s1276_s5 + $0x8] sm:$0xff]  ;;  %v585_v36 = vpop.permute.xlu1 %584  ;;  %v570_v37 = vpop.permute.xlu2 %569 }
 0x1cd   :  { %v476_v61 = vpop.f32.mrf.mxu1 }
 0x1ce   :  { %v477_v8 = vadd.f32 %v476_v61, %v357_v17  ;;  %v921_v17 = vld [vmem:[%s1276_s5] sm:$0xff]  ;;  %v560_v41 = vpop.permute.xlu1 %559  ;;  %v565_v42 = vpop.permute.xlu2 %564 }
 0x1d0   :  { %v507_v16 = vmax.f32 %v477_v8, 0.0 }
 0x1d5   :  { %v478_v0 = vpop.f32.mrf.mxu1 }
 0x1d6   :  { %v479_v3 = vadd.f32 %v478_v0, %v362_v18  ;;  %v927_v18 = vld [vmem:[%s1276_s5 + $0x30] sm:$0xff] }
 0x1d8   :  { %v508_v11 = vmax.f32 %v479_v3, 0.0 }
 0x1da   :  { %v536_v21 = vpack.c.bf16 %v508_v11, %v507_v16 }
 0x1dd   :  { %v481_v1 = vpop.f32.mrf.mxu1 }
 0x1de   :  { %v482_v60 = vadd.f32 %v481_v1, %v367_v15 }
 0x1e0   :  { %v509_v9 = vmax.f32 %v482_v60, 0.0 }
 0x1e5   :  { %v483_v2 = vpop.f32.mrf.mxu1 }
 0x1e6   :  { %v484_v62 = vadd.f32 %v483_v2, %v372_v23  ;;  %v923_v23 = vld [vmem:[%s1276_s5 + $0x10] sm:$0xff] }
 0x1e8   :  { %v510_v4 = vmax.f32 %v484_v62, 0.0 }
 0x1ea   :  { %v537_v12 = vpack.c.bf16 %v510_v4, %v509_v9 }
 0x1ed   :  { %v486_v5 = vpop.f32.mrf.mxu1 }
 0x1ee   :  { %v487_v6 = vadd.f32 %v486_v5, %v377_v19  ;;  %v506_v19 = vmax.f32 %v474_v10, 0.0 }
 0x1f0   :  { %v511_v52 = vmax.f32 %v487_v6, 0.0 }
 0x1f5   :  { %v488_v56 = vpop.f32.mrf.mxu1 }
 0x1f6   :  { %v489_v57 = vadd.f32 %v488_v56, %v382_v14  ;;  %v505_v14 = vmax.f32 %v472_v13, 0.0 }
 0x1f8   :  { %v512_v63 = vmax.f32 %v489_v57, 0.0  ;;  %v535_v15 = vpack.c.bf16 %v506_v19, %v505_v14 }
 0x1fa   :  { %v538_v7 = vpack.c.bf16 %v512_v63, %v511_v52 }
 0x1fc   :  { %687 = vmatpush.bf16.msra.mxu2 %v538_v7  ;;  %939 = vmatpush.bf16.msrb.mxu3 %v538_v7 }
 0x200   :  { %688 = vmatpush.bf16.msra.mxu2 %v537_v12  ;;  %940 = vmatpush.bf16.msrb.mxu3 %v537_v12 }
 0x204   :  { %689 = vmatpush.bf16.msra.mxu2 %v536_v21  ;;  %941 = vmatpush.bf16.msrb.mxu3 %v536_v21 }
 0x208   :  { %690 = vmatpush.bf16.msra.mxu2 %v535_v15  ;;  %942 = vmatpush.bf16.msrb.mxu3 %v535_v15 }
 0x20c   :  { %691 = vmatpush.bf16.msra.mxu2 %v534_v44  ;;  %943 = vmatpush.bf16.msrb.mxu3 %v534_v44 }
 0x210   :  { %692 = vmatpush.bf16.msra.mxu2 %v1237_v32  ;;  %944 = vmatpush.bf16.msrb.mxu3 %v1237_v32  ;;  %v635_v32 = vpop.permute.xlu0 %634 }
 0x213   :  { %693 = vmatmul.bf16.vlgmr.msra.gmra.mxu2 %v921_v17  ;;  %723 = vmatmul.bf16.vlgmr.msrb.gmra.mxu3 %v927_v18 }
 0x218   :  { %v610_v35 = vpop.permute.xlu0 %609 }
 0x220   :  { %v605_v40 = vpop.permute.xlu0 %604 }
 0x223   :  { %698 = vmatmul.bf16.gmra.mxu2 %v922_v20  ;;  %728 = vmatmul.bf16.gmra.mxu3 %v928_v22 }
 0x228   :  { %v580_v49 = vpop.permute.xlu0 %579 }
 0x230   :  { %v575_v54 = vpop.permute.xlu0 %574 }
 0x233   :  { %703 = vmatmul.bf16.gmra.mxu2 %v923_v23 }
 0x243   :  { %708 = vmatmul.bf16.gmra.mxu2 %v924_v24 }
 0x253   :  { %713 = vmatmul.bf16.gmra.mxu2 %v925_v25 }
 0x263   :  { %718 = vmatmul.bf16.gmra.mxu2 %v926_v26 }
 0x296   :  { %v694_v38 = vpop.f32.mrf.mxu2  ;;  %v724_v39 = vpop.f32.mrf.mxu3 }
 0x297   :  { %v695_v43 = vadd.f32 %v694_v38, %v560_v41  ;;  %v725_v5 = vadd.f32 %v724_v39, %v620_v28 }
 0x299   :  { %v734_v47 = vmax.f32 %v695_v43, 0.0  ;;  %v746_v3 = vmax.f32 %v725_v5, 0.0 }
 0x29e   :  { %v696_v44 = vpop.f32.mrf.mxu2  ;;  %v726_v45 = vpop.f32.mrf.mxu3 }
 0x29f   :  { %v697_v46 = vadd.f32 %v696_v44, %v565_v42  ;;  %v727_v0 = vadd.f32 %v726_v45, %v625_v29 }
 0x2a1   :  { %v735_v48 = vmax.f32 %v697_v46, 0.0  ;;  %v747_v60 = vmax.f32 %v727_v0, 0.0 }
 0x2a3   :  { %v751_v50 = vpack.c.bf16 %v735_v48, %v734_v47  ;;  %v757_v7 = vpack.c.bf16 %v747_v60, %v746_v3 }
 0x2a6   :  { %v699_v51 = vpop.f32.mrf.mxu2  ;;  %v729_v53 = vpop.f32.mrf.mxu3 }
 0x2a7   :  { %v700_v55 = vadd.f32 %v699_v51, %v570_v37  ;;  %v730_v58 = vadd.f32 %v729_v53, %v630_v27 }
 0x2a9   :  { %v736_v6 = vmax.f32 %v700_v55, 0.0  ;;  %v748_v56 = vmax.f32 %v730_v58, 0.0 }
 0x2ae   :  { %v701_v59 = vpop.f32.mrf.mxu2  ;;  %v731_v61 = vpop.f32.mrf.mxu3 }
 0x2af   :  { %v702_v1 = vadd.f32 %v701_v59, %v575_v54  ;;  %v732_v2 = vadd.f32 %v731_v61, %v635_v32 }
 0x2b1   :  { %v737_v62 = vmax.f32 %v702_v1, 0.0  ;;  %v749_v57 = vmax.f32 %v732_v2, 0.0 }
 0x2b3   :  { %v752_v52 = vpack.c.bf16 %v737_v62, %v736_v6  ;;  %v758_v63 = vpack.c.bf16 %v749_v57, %v748_v56 }
 0x2b5   :  { %765 = vmatpush.bf16.msra.mxu3 %v758_v63 }
 0x2b6   :  { %v704_v4 = vpop.f32.mrf.mxu2 }
 0x2b7   :  { %v705_v29 = vadd.f32 %v704_v4, %v580_v49 }
 0x2b9   :  { %766 = vmatpush.bf16.msra.mxu3 %v757_v7  ;;  %v738_v38 = vmax.f32 %v705_v29, 0.0 }
 0x2be   :  { %v706_v8 = vpop.f32.mrf.mxu2 }
 0x2bf   :  { %v707_v26 = vadd.f32 %v706_v8, %v585_v36 }
 0x2c1   :  { %v739_v37 = vmax.f32 %v707_v26, 0.0 }
 0x2c6   :  { %v709_v9 = vpop.f32.mrf.mxu2 }
 0x2c7   :  { %v710_v24 = vadd.f32 %v709_v9, %v590_v33  ;;  %v763_v33 = vpop.permute.xlu0 %762 }
 0x2c9   :  { %v740_v32 = vmax.f32 %v710_v24, 0.0 }
 0x2ce   :  { %v711_v10 = vpop.f32.mrf.mxu2 }
 0x2cf   :  { %v712_v20 = vadd.f32 %v711_v10, %v595_v34 }
 0x2d1   :  { %v741_v27 = vmax.f32 %v712_v20, 0.0 }
 0x2d6   :  { %v714_v11 = vpop.f32.mrf.mxu2 }
 0x2d7   :  { %v715_v15 = vadd.f32 %v714_v11, %v600_v31  ;;  %v750_v31 = vld [vmem:[%s1278_s7] sm:$0x1] }
 0x2d9   :  { %v742_v25 = vmax.f32 %v715_v15, 0.0 }
 0x2de   :  { %v716_v12 = vpop.f32.mrf.mxu2 }
 0x2df   :  { %v717_v21 = vadd.f32 %v716_v12, %v605_v40 }
 0x2e1   :  { %v743_v22 = vmax.f32 %v717_v21, 0.0 }
 0x2e3   :  { %v755_v28 = vpack.c.bf16 %v743_v22, %v742_v25 }
 0x2e6   :  { %v719_v13 = vpop.f32.mrf.mxu2 }
 0x2e7   :  { %v720_v16 = vadd.f32 %v719_v13, %v610_v35  ;;  %v754_v35 = vpack.c.bf16 %v741_v27, %v740_v32 }
 0x2e9   :  { %v744_v17 = vmax.f32 %v720_v16, 0.0 }
 0x2ee   :  { %v721_v19 = vpop.f32.mrf.mxu2 }
 0x2ef   :  { %v722_v14 = vadd.f32 %v721_v19, %v615_v30  ;;  %v753_v30 = vpack.c.bf16 %v739_v37, %v738_v38 }
 0x2f1   :  { %v745_v18 = vmax.f32 %v722_v14, 0.0 }
 0x2f3   :  { %v756_v23 = vpack.c.bf16 %v745_v18, %v744_v17 }
 0x2f5   :  { %767 = vmatpush.bf16.msra.mxu3 %v756_v23 }
 0x2f9   :  { %768 = vmatpush.bf16.msra.mxu3 %v755_v28 }
 0x2fd   :  { %769 = vmatpush.bf16.msra.mxu3 %v754_v35 }
 0x301   :  { %770 = vmatpush.bf16.msra.mxu3 %v753_v30 }
 0x305   :  { %771 = vmatpush.bf16.msra.mxu3 %v752_v52 }
 0x309   :  { %772 = vmatpush.bf16.msra.mxu3 %v751_v50 }
 0x30c   :  { %773 = vmatmul.bf16.vlgmr.msra.gmra.mxu3 %v750_v31 }
 0x38f   :  { %v774_v34 = vpop.f32.mrf.mxu3 }
 0x390   :  { %v775_v36 = vadd.f32 %v774_v34, %v763_v33 }
 0x392   :  { %v778_v39 = vmax.f32 %v775_v36, 0.0 }
 0x394   :  { %779 = vst [vmem:[#allocation2] sm:$0x3] %v778_v39 }
 0x395   :  { %790 = dma.vmem_to_hbm [thread:$0]  %s786_s2, 32, %s788_s15, [#allocation3]  }
 0x397   :  { %v776_v40 = vpop.f32.mrf.mxu3 }
 0x398   :  { %974 = dma.done.wait [#allocation3], 32  }
 0x399   :  { %975 = vsyncadd [#allocation3], 4294967264 }
 0x39a   :  { %795 = vsyncpa [#allocation3], 1 }

// kernel: tpu_custom_call.1
= control target key start
LH: loop header
LB: loop body
LE: loop exit
PB: predicated region body
PF: predicated region fallthrough
CT: control target
= control target key end

     0   :  { %v976_v2 = vmov 0   ;;  %vm194_vm0 = vcmask 130048   ;;  %s1271_s0 = inlined_call_operand.vmem [shape: bf16[16,128], index: 0, kind: input, shape index: {}]   ;;  %s1272_s1 = inlined_call_operand.vmem [shape: bf16[128,16], index: 1, kind: input, shape index: {}]   ;;  %s1273_s2 = inlined_call_operand.vmem [shape: f32[128,1], index: 2, kind: input, shape index: {}]   ;;  %s1274_s3 = inlined_call_operand.vmem [shape: bf16[128,128], index: 3, kind: input, shape index: {}]   ;;  %s1275_s4 = inlined_call_operand.vmem [shape: f32[128,1], index: 4, kind: input, shape index: {}]   ;;  %s1276_s5 = inlined_call_operand.vmem [shape: bf16[128,128], index: 5, kind: input, shape index: {}]   ;;  %s1277_s6 = inlined_call_operand.vmem [shape: f32[128,1], index: 6, kind: input, shape index: {}]   ;;  %s1278_s7 = inlined_call_operand.vmem [shape: bf16[2,128], index: 7, kind: input, shape index: {}]   ;;  %s1279_s8 = inlined_call_operand.vmem [shape: f32[2,1], index: 8, kind: input, shape index: {}]   ;;  %s1280_s9 = inlined_call_operand.hbm [shape: f32[2,128], index: 9, kind: output, shape index: {}]  }
   0x1   :  { %v66_v0 = vld [vmem:[%s1273_s2 + $0x70] sm:$0xff]  ;;  %v912_v1 = vld [vmem:[%s1271_s0] sm:$0xff]  ;;  %947 = vset.pattern.permute.xlu0 %v976_v2  ;;  %949 = vset.pattern.permute.xlu2 %v976_v2 }
   0x2   :  { %v904_v3 = vld [vmem:[%s1272_s1] sm:$0xff]  ;;  %v62_v5 = vld [vmem:[%s1273_s2 + $0x50] sm:$0xff]  ;;  %140 = vperm.xlu0 %947, %v66_v0   ;;  %226 = vmatpush.bf16.msra.mxu0 %v912_v1 }
   0x3   :  { %v64_v4 = vld [vmem:[%s1273_s2 + $0x60] sm:$0xff]  ;;  %948 = vset.pattern.permute.xlu1 %v976_v2  ;;  %120 = vperm.xlu2 %949, %v62_v5  }
   0x4   :  { %130 = vperm.xlu1 %948, %v64_v4  }
   0x5   :  { %832 = vmatmul.msk.bf16.vlgmr.msra.gmra.mxu0 %vm194_vm0, %v904_v3 }
   0x6   :  { %14 = vsyncpa [#allocation3], 0  ;;  %v67_v6 = vld [vmem:[%s1273_s2 + $0x78] sm:$0xff]  ;;  %v65_v8 = vld [vmem:[%s1273_s2 + $0x68] sm:$0xff]  ;;  %s977_s12 = smov [#allocation2]   ;;  %s787_s15 = sshll.u32 %s1280_s9, 4  ;;  %s788_s15 = int_to_ptr.hbm [resolvable:$true] %s787_s15 }
   0x7   :  { %v63_v7 = vld [vmem:[%s1273_s2 + $0x58] sm:$0xff]  ;;  %v60_v9 = vld [vmem:[%s1273_s2 + $0x40] sm:$0xff]  ;;  %v58_v10 = vld [vmem:[%s1273_s2 + $0x30] sm:$0xff] }
   0x8   :  { %v905_v11 = vld [vmem:[%s1272_s1 + $0x8] sm:$0xff]  ;;  %v59_v13 = vld [vmem:[%s1273_s2 + $0x38] sm:$0xff]  ;;  %v56_v15 = vld [vmem:[%s1273_s2 + $0x20] sm:$0xff] }
   0x9   :  { %v61_v12 = vld [vmem:[%s1273_s2 + $0x48] sm:$0xff]  ;;  %v54_v16 = vld [vmem:[%s1273_s2 + $0x10] sm:$0xff]  ;;  %v52_v17 = vld [vmem:[%s1273_s2] sm:$0xff] }
   0xa   :  { %145 = vperm.xlu0 %947, %v67_v6   ;;  %v57_v14 = vld [vmem:[%s1273_s2 + $0x28] sm:$0xff]  ;;  %v906_v18 = vld [vmem:[%s1272_s1 + $0x10] sm:$0xff]  ;;  %v55_v19 = vld [vmem:[%s1273_s2 + $0x18] sm:$0xff] }
   0xb   :  { %125 = vperm.xlu2 %949, %v63_v7   ;;  %v53_v20 = vld [vmem:[%s1273_s2 + $0x8] sm:$0xff]  ;;  %v322_v21 = vld [vmem:[%s1275_s4 + $0x70] sm:$0xff]  ;;  %v323_v22 = vld [vmem:[%s1275_s4 + $0x78] sm:$0xff]  ;;  %s785_s2 = sshll.u32 %s977_s12, 4  ;;  %s786_s2 = int_to_ptr.vmem [resolvable:$true] %s785_s2 }
   0xc   :  { %135 = vperm.xlu1 %948, %v65_v8   ;;  %v320_v23 = vld [vmem:[%s1275_s4 + $0x60] sm:$0xff]  ;;  %v907_v24 = vld [vmem:[%s1272_s1 + $0x18] sm:$0xff]  ;;  %v321_v25 = vld [vmem:[%s1275_s4 + $0x68] sm:$0xff] }
   0xd   :  { %v318_v26 = vld [vmem:[%s1275_s4 + $0x50] sm:$0xff]  ;;  %v319_v27 = vld [vmem:[%s1275_s4 + $0x58] sm:$0xff]  ;;  %v316_v28 = vld [vmem:[%s1275_s4 + $0x40] sm:$0xff] }
   0xe   :  { %v317_v29 = vld [vmem:[%s1275_s4 + $0x48] sm:$0xff]  ;;  %v314_v30 = vld [vmem:[%s1275_s4 + $0x30] sm:$0xff]  ;;  %v908_v31 = vld [vmem:[%s1272_s1 + $0x20] sm:$0xff] }
   0xf   :  { %v315_v32 = vld [vmem:[%s1275_s4 + $0x38] sm:$0xff]  ;;  %v312_v33 = vld [vmem:[%s1275_s4 + $0x20] sm:$0xff]  ;;  %v313_v34 = vld [vmem:[%s1275_s4 + $0x28] sm:$0xff] }
  0x10   :  { %v310_v35 = vld [vmem:[%s1275_s4 + $0x10] sm:$0xff]  ;;  %v311_v36 = vld [vmem:[%s1275_s4 + $0x18] sm:$0xff]  ;;  %v308_v37 = vld [vmem:[%s1275_s4] sm:$0xff] }
  0x11   :  { %v909_v38 = vld [vmem:[%s1272_s1 + $0x28] sm:$0xff]  ;;  %v555_v40 = vld [vmem:[%s1277_s6 + $0x70] sm:$0xff]  ;;  %v556_v41 = vld [vmem:[%s1277_s6 + $0x78] sm:$0xff] }
  0x12   :  { %110 = vperm.xlu0 %947, %v60_v9   ;;  %v309_v39 = vld [vmem:[%s1275_s4 + $0x8] sm:$0xff]  ;;  %v553_v42 = vld [vmem:[%s1277_s6 + $0x60] sm:$0xff]  ;;  %v551_v44 = vld [vmem:[%s1277_s6 + $0x50] sm:$0xff] }
  0x13   :  { %100 = vperm.xlu2 %949, %v58_v10   ;;  %v554_v43 = vld [vmem:[%s1277_s6 + $0x68] sm:$0xff]  ;;  %v910_v45 = vld [vmem:[%s1272_s1 + $0x30] sm:$0xff]  ;;  %v552_v46 = vld [vmem:[%s1277_s6 + $0x58] sm:$0xff] }
  0x14   :  { %115 = vperm.xlu1 %948, %v61_v12   ;;  %v549_v47 = vld [vmem:[%s1277_s6 + $0x40] sm:$0xff]  ;;  %v550_v48 = vld [vmem:[%s1277_s6 + $0x48] sm:$0xff]  ;;  %v547_v49 = vld [vmem:[%s1277_s6 + $0x30] sm:$0xff] }
  0x15   :  { %833 = vmatmul.msk.bf16.gmra.mxu0 %vm194_vm0, %v905_v11  ;;  %v548_v50 = vld [vmem:[%s1277_s6 + $0x38] sm:$0xff]  ;;  %v545_v51 = vld [vmem:[%s1277_s6 + $0x20] sm:$0xff]  ;;  %v546_v54 = vld [vmem:[%s1277_s6 + $0x28] sm:$0xff] }
  0x16   :  { %v911_v53 = vld [vmem:[%s1272_s1 + $0x38] sm:$0xff]  ;;  %v543_v55 = vld [vmem:[%s1277_s6 + $0x10] sm:$0xff]  ;;  %v541_v59 = vld [vmem:[%s1277_s6] sm:$0xff] }
  0x17   :  { %v544_v58 = vld [vmem:[%s1277_s6 + $0x18] sm:$0xff]  ;;  %v542_v61 = vld [vmem:[%s1277_s6 + $0x8] sm:$0xff]  ;;  %v759_v0 = vld [vmem:[%s1279_s8] sm:$0x3] }
  0x1a   :  { %105 = vperm.xlu0 %947, %v59_v13  }
  0x1b   :  { %95 = vperm.xlu2 %949, %v57_v14  }
  0x1c   :  { %90 = vperm.xlu1 %948, %v56_v15  }
  0x22   :  { %80 = vperm.xlu0 %947, %v54_v16  }
  0x23   :  { %70 = vperm.xlu2 %949, %v52_v17  }
  0x24   :  { %85 = vperm.xlu1 %948, %v55_v19  }
  0x25   :  { %834 = vmatmul.msk.bf16.gmra.mxu0 %vm194_vm0, %v906_v18 }
  0x2a   :  { %75 = vperm.xlu0 %947, %v53_v20  }
  0x2b   :  { %401 = vperm.xlu2 %949, %v323_v22  }
  0x2c   :  { %396 = vperm.xlu1 %948, %v322_v21  }
  0x32   :  { %386 = vperm.xlu0 %947, %v320_v23  }
  0x33   :  { %376 = vperm.xlu2 %949, %v318_v26  }
  0x34   :  { %391 = vperm.xlu1 %948, %v321_v25  }
  0x35   :  { %835 = vmatmul.msk.bf16.gmra.mxu0 %vm194_vm0, %v907_v24 }
  0x3a   :  { %381 = vperm.xlu0 %947, %v319_v27  }
  0x3b   :  { %371 = vperm.xlu2 %949, %v317_v29  }
  0x3c   :  { %366 = vperm.xlu1 %948, %v316_v28  }
  0x42   :  { %356 = vperm.xlu0 %947, %v314_v30  }
  0x43   :  { %346 = vperm.xlu2 %949, %v312_v33  }
  0x44   :  { %361 = vperm.xlu1 %948, %v315_v32  }
  0x45   :  { %836 = vmatmul.msk.bf16.gmra.mxu0 %vm194_vm0, %v908_v31 }
  0x4a   :  { %351 = vperm.xlu0 %947, %v313_v34  }
  0x4b   :  { %341 = vperm.xlu2 %949, %v311_v36  }
  0x4c   :  { %336 = vperm.xlu1 %948, %v310_v35  }
  0x52   :  { %326 = vperm.xlu0 %947, %v308_v37  }
  0x53   :  { %629 = vperm.xlu2 %949, %v555_v40  }
  0x54   :  { %331 = vperm.xlu1 %948, %v309_v39  }
  0x55   :  { %837 = vmatmul.msk.bf16.gmra.mxu0 %vm194_vm0, %v909_v38 }
  0x5a   :  { %634 = vperm.xlu0 %947, %v556_v41  }
  0x5b   :  { %624 = vperm.xlu2 %949, %v554_v43  }
  0x5c   :  { %619 = vperm.xlu1 %948, %v553_v42  }
  0x5d   :  { %v1188_v52 = vpop.permute.xlu2 %120 }
  0x62   :  { %609 = vperm.xlu0 %947, %v551_v44  }
  0x63   :  { %599 = vperm.xlu2 %949, %v549_v47  }
  0x64   :  { %614 = vperm.xlu1 %948, %v552_v46  }
  0x65   :  { %838 = vmatmul.msk.bf16.gmra.mxu0 %vm194_vm0, %v910_v45  ;;  %v126_v60 = vpop.permute.xlu2 %125 }
  0x6a   :  { %604 = vperm.xlu0 %947, %v550_v48  }
  0x6b   :  { %594 = vperm.xlu2 %949, %v548_v50  }
  0x6c   :  { %589 = vperm.xlu1 %948, %v547_v49  }
  0x6d   :  { %v101_v2 = vpop.permute.xlu2 %100 }
  0x72   :  { %579 = vperm.xlu0 %947, %v545_v51  }
  0x73   :  { %569 = vperm.xlu2 %949, %v543_v55  }
  0x74   :  { %v141_v56 = vpop.permute.xlu0 %140  ;;  %584 = vperm.xlu1 %948, %v546_v54  }
  0x75   :  { %839 = vmatmul.msk.bf16.gmra.mxu0 %vm194_vm0, %v911_v53  ;;  %v96_v7 = vpop.permute.xlu2 %95 }
  0x76   :  { %v131_v57 = vpop.permute.xlu1 %130 }
  0x7a   :  { %574 = vperm.xlu0 %947, %v544_v58  }
  0x7b   :  { %564 = vperm.xlu2 %949, %v542_v61  }
  0x7c   :  { %v146_v62 = vpop.permute.xlu0 %145  ;;  %559 = vperm.xlu1 %948, %v541_v59  }
  0x7d   :  { %v71_v11 = vpop.permute.xlu2 %70 }
  0x7e   :  { %v136_v63 = vpop.permute.xlu1 %135 }
  0x82   :  { %762 = vperm.xlu0 %947, %v759_v0   ;;  %v228_v1 = vpop.f32.mrf.mxu0 }
  0x83   :  { %v229_v15 = vadd.f32 %v228_v1, %v71_v11 }
  0x84   :  { %v111_v3 = vpop.permute.xlu0 %110 }
  0x85   :  { %v268_v21 = vmax.f32 %v229_v15, 0.0 }
  0x86   :  { %v116_v4 = vpop.permute.xlu1 %115 }
  0x8a   :  { %v230_v5 = vpop.f32.mrf.mxu0 }
  0x8c   :  { %v106_v6 = vpop.permute.xlu0 %105 }
  0x8e   :  { %v91_v8 = vpop.permute.xlu1 %90 }
  0x92   :  { %v233_v9 = vpop.f32.mrf.mxu0 }
  0x94   :  { %v81_v10 = vpop.permute.xlu0 %80 }
  0x95   :  { %v234_v13 = vadd.f32 %v233_v9, %v81_v10  ;;  %v917_v9 = vld [vmem:[%s1274_s3 + $0x20] sm:$0xff]  ;;  %v918_v10 = vld [vmem:[%s1274_s3 + $0x28] sm:$0xff] }
  0x96   :  { %v86_v12 = vpop.permute.xlu1 %85 }
  0x97   :  { %v270_v18 = vmax.f32 %v234_v13, 0.0 }
  0x9a   :  { %v235_v14 = vpop.f32.mrf.mxu0 }
  0x9b   :  { %v236_v16 = vadd.f32 %v235_v14, %v86_v12 }
  0x9c   :  { %v76_v17 = vpop.permute.xlu0 %75 }
  0x9d   :  { %v271_v19 = vmax.f32 %v236_v16, 0.0  ;;  %v231_v20 = vadd.f32 %v230_v5, %v76_v17  ;;  %v402_v16 = vpop.permute.xlu2 %401 }
  0x9e   :  { %v397_v11 = vpop.permute.xlu1 %396 }
  0x9f   :  { %v269_v22 = vmax.f32 %v231_v20, 0.0  ;;  %v301_v23 = vpack.c.bf16 %v271_v19, %v270_v18 }
  0xa1   :  { %v300_v24 = vpack.c.bf16 %v269_v22, %v268_v21 }
  0xa2   :  { %v238_v25 = vpop.f32.mrf.mxu0 }
  0xa3   :  { %v239_v26 = vadd.f32 %v238_v25, %v91_v8  ;;  %v916_v8 = vld [vmem:[%s1274_s3 + $0x18] sm:$0xff] }
  0xa4   :  { %v387_v12 = vpop.permute.xlu0 %386 }
  0xa5   :  { %v272_v29 = vmax.f32 %v239_v26, 0.0  ;;  %v377_v19 = vpop.permute.xlu2 %376 }
  0xa6   :  { %v392_v13 = vpop.permute.xlu1 %391 }
  0xaa   :  { %v240_v27 = vpop.f32.mrf.mxu0 }
  0xab   :  { %v241_v28 = vadd.f32 %v240_v27, %v96_v7  ;;  %v915_v7 = vld [vmem:[%s1274_s3 + $0x10] sm:$0xff] }
  0xac   :  { %v382_v14 = vpop.permute.xlu0 %381 }
  0xad   :  { %v273_v30 = vmax.f32 %v241_v28, 0.0 }
  0xae   :  { %v367_v15 = vpop.permute.xlu1 %366 }
  0xaf   :  { %v302_v31 = vpack.c.bf16 %v273_v30, %v272_v29 }
  0xb2   :  { %v243_v32 = vpop.f32.mrf.mxu0 }
  0xb3   :  { %v244_v33 = vadd.f32 %v243_v32, %v101_v2 }
  0xb4   :  { %v357_v17 = vpop.permute.xlu0 %356 }
  0xb5   :  { %v274_v36 = vmax.f32 %v244_v33, 0.0 }
  0xb6   :  { %v362_v18 = vpop.permute.xlu1 %361 }
  0xba   :  { %v245_v34 = vpop.f32.mrf.mxu0 }
  0xbb   :  { %v246_v35 = vadd.f32 %v245_v34, %v106_v6 }
  0xbc   :  { %v352_v20 = vpop.permute.xlu0 %351 }
  0xbd   :  { %v275_v37 = vmax.f32 %v246_v35, 0.0 }
  0xbe   :  { %v337_v21 = vpop.permute.xlu1 %336 }
  0xbf   :  { %v303_v38 = vpack.c.bf16 %v275_v37, %v274_v36 }
  0xc2   :  { %v248_v39 = vpop.f32.mrf.mxu0 }
  0xc3   :  { %v249_v5 = vadd.f32 %v248_v39, %v111_v3  ;;  %v914_v3 = vld [vmem:[%s1274_s3 + $0x8] sm:$0xff] }
  0xc6   :  { %v332_v27 = vpop.permute.xlu1 %331 }
  0xca   :  { %v250_v40 = vpop.f32.mrf.mxu0 }
  0xcb   :  { %v251_v0 = vadd.f32 %v250_v40, %v116_v4  ;;  %v920_v4 = vld [vmem:[%s1274_s3 + $0x38] sm:$0xff] }
  0xd2   :  { %v253_v41 = vpop.f32.mrf.mxu0 }
  0xd3   :  { %v254_v59 = vadd.f32 %v253_v41, %v1188_v52  ;;  %v913_v52 = vld [vmem:[%s1274_s3] sm:$0xff] }
  0xd5   :  { %v278_v6 = vmax.f32 %v254_v59, 0.0 }
  0xda   :  { %v255_v42 = vpop.f32.mrf.mxu0 }
  0xdb   :  { %v256_v54 = vadd.f32 %v255_v42, %v126_v60 }
  0xdd   :  { %v279_v1 = vmax.f32 %v256_v54, 0.0 }
  0xe2   :  { %v258_v43 = vpop.f32.mrf.mxu0 }
  0xe3   :  { %v259_v50 = vadd.f32 %v258_v43, %v131_v57  ;;  %v276_v57 = vmax.f32 %v249_v5, 0.0 }
  0xe5   :  { %v280_v61 = vmax.f32 %v259_v50, 0.0 }
  0xea   :  { %v260_v44 = vpop.f32.mrf.mxu0 }
  0xeb   :  { %v261_v48 = vadd.f32 %v260_v44, %v136_v63  ;;  %v919_v63 = vld [vmem:[%s1274_s3 + $0x30] sm:$0xff] }
  0xed   :  { %v281_v55 = vmax.f32 %v261_v48, 0.0 }
  0xef   :  { %v306_v2 = vpack.c.bf16 %v281_v55, %v280_v61 }
  0xf2   :  { %v263_v45 = vpop.f32.mrf.mxu0 }
  0xf3   :  { %v264_v46 = vadd.f32 %v263_v45, %v141_v56  ;;  %v277_v56 = vmax.f32 %v251_v0, 0.0 }
  0xf5   :  { %v282_v51 = vmax.f32 %v264_v46, 0.0  ;;  %v304_v60 = vpack.c.bf16 %v277_v56, %v276_v57 }
  0xfa   :  { %v265_v47 = vpop.f32.mrf.mxu0 }
  0xfb   :  { %v266_v49 = vadd.f32 %v265_v47, %v146_v62  ;;  %v305_v62 = vpack.c.bf16 %v279_v1, %v278_v6 }
  0xfd   :  { %v283_v53 = vmax.f32 %v266_v49, 0.0 }
  0xff   :  { %v307_v58 = vpack.c.bf16 %v283_v53, %v282_v51 }
 0x101   :  { %452 = vmatpush.bf16.msra.mxu1 %v307_v58  ;;  %929 = vmatpush.bf16.msra.mxu3 %v307_v58 }
 0x105   :  { %453 = vmatpush.bf16.msra.mxu1 %v306_v2  ;;  %930 = vmatpush.bf16.msra.mxu3 %v306_v2 }
 0x109   :  { %454 = vmatpush.bf16.msra.mxu1 %v305_v62  ;;  %931 = vmatpush.bf16.msra.mxu3 %v305_v62 }
 0x10d   :  { %455 = vmatpush.bf16.msra.mxu1 %v304_v60  ;;  %932 = vmatpush.bf16.msra.mxu3 %v304_v60 }
 0x111   :  { %456 = vmatpush.bf16.msra.mxu1 %v303_v38  ;;  %933 = vmatpush.bf16.msra.mxu3 %v303_v38 }
 0x115   :  { %457 = vmatpush.bf16.msra.mxu1 %v302_v31  ;;  %934 = vmatpush.bf16.msra.mxu3 %v302_v31 }
 0x119   :  { %458 = vmatpush.bf16.msra.mxu1 %v301_v23  ;;  %935 = vmatpush.bf16.msra.mxu3 %v301_v23  ;;  %v372_v23 = vpop.permute.xlu2 %371 }
 0x11d   :  { %459 = vmatpush.bf16.msra.mxu1 %v300_v24  ;;  %936 = vmatpush.bf16.msra.mxu3 %v300_v24  ;;  %v327_v24 = vpop.permute.xlu0 %326 }
 0x120   :  { %460 = vmatmul.bf16.vlgmr.msra.gmra.mxu1 %v913_v52  ;;  %490 = vmatmul.bf16.vlgmr.msra.gmra.mxu3 %v919_v63 }
 0x121   :  { %v347_v33 = vpop.permute.xlu2 %346 }
 0x129   :  { %v342_v38 = vpop.permute.xlu2 %341 }
 0x130   :  { %465 = vmatmul.bf16.gmra.mxu1 %v914_v3  ;;  %495 = vmatmul.bf16.gmra.mxu3 %v920_v4 }
 0x140   :  { %470 = vmatmul.bf16.gmra.mxu1 %v915_v7 }
 0x150   :  { %475 = vmatmul.bf16.gmra.mxu1 %v916_v8 }
 0x160   :  { %480 = vmatmul.bf16.gmra.mxu1 %v917_v9 }
 0x170   :  { %485 = vmatmul.bf16.gmra.mxu1 %v918_v10 }
 0x19d   :  { %v461_v22 = vpop.f32.mrf.mxu1 }
 0x19e   :  { %v462_v26 = vadd.f32 %v461_v22, %v327_v24  ;;  %v928_v22 = vld [vmem:[%s1276_s5 + $0x38] sm:$0xff] }
 0x19f   :  { %v924_v24 = vld [vmem:[%s1276_s5 + $0x18] sm:$0xff] }
 0x1a0   :  { %v501_v30 = vmax.f32 %v462_v26, 0.0  ;;  %v926_v26 = vld [vmem:[%s1276_s5 + $0x28] sm:$0xff] }
 0x1a3   :  { %v491_v25 = vpop.f32.mrf.mxu3 }
 0x1a4   :  { %v492_v49 = vadd.f32 %v491_v25, %v387_v12  ;;  %v925_v25 = vld [vmem:[%s1276_s5 + $0x20] sm:$0xff] }
 0x1a5   :  { %v463_v28 = vpop.f32.mrf.mxu1 }
 0x1a6   :  { %v464_v29 = vadd.f32 %v463_v28, %v332_v27  ;;  %v513_v55 = vmax.f32 %v492_v49, 0.0  ;;  %v630_v27 = vpop.permute.xlu2 %629  ;;  %v620_v28 = vpop.permute.xlu1 %619 }
 0x1a8   :  { %v502_v31 = vmax.f32 %v464_v29, 0.0 }
 0x1aa   :  { %v1237_v32 = vpack.c.bf16 %v502_v31, %v501_v30 }
 0x1ab   :  { %v493_v34 = vpop.f32.mrf.mxu3 }
 0x1ac   :  { %v494_v46 = vadd.f32 %v493_v34, %v392_v13 }
 0x1ad   :  { %v466_v35 = vpop.f32.mrf.mxu1 }
 0x1ae   :  { %v467_v37 = vadd.f32 %v466_v35, %v337_v21  ;;  %v514_v53 = vmax.f32 %v494_v46, 0.0  ;;  %v625_v29 = vpop.permute.xlu2 %624  ;;  %v615_v30 = vpop.permute.xlu1 %614 }
 0x1b0   :  { %v503_v41 = vmax.f32 %v467_v37, 0.0  ;;  %v539_v58 = vpack.c.bf16 %v514_v53, %v513_v55 }
 0x1b3   :  { %v496_v36 = vpop.f32.mrf.mxu3 }
 0x1b4   :  { %v497_v43 = vadd.f32 %v496_v36, %v397_v11 }
 0x1b5   :  { %v468_v39 = vpop.f32.mrf.mxu1 }
 0x1b6   :  { %v469_v40 = vadd.f32 %v468_v39, %v342_v38  ;;  %v515_v50 = vmax.f32 %v497_v43, 0.0  ;;  %v600_v31 = vpop.permute.xlu2 %599 }
 0x1b8   :  { %v504_v42 = vmax.f32 %v469_v40, 0.0 }
 0x1ba   :  { %v534_v44 = vpack.c.bf16 %v504_v42, %v503_v41 }
 0x1bb   :  { %v498_v45 = vpop.f32.mrf.mxu3 }
 0x1bc   :  { %v499_v47 = vadd.f32 %v498_v45, %v402_v16 }
 0x1bd   :  { %v471_v48 = vpop.f32.mrf.mxu1 }
 0x1be   :  { %v516_v51 = vmax.f32 %v499_v47, 0.0  ;;  %v472_v13 = vadd.f32 %v471_v48, %v347_v33  ;;  %v590_v33 = vpop.permute.xlu1 %589  ;;  %v595_v34 = vpop.permute.xlu2 %594 }
 0x1c0   :  { %v540_v54 = vpack.c.bf16 %v516_v51, %v515_v50 }
 0x1c2   :  { %685 = vmatpush.bf16.msra.mxu2 %v540_v54  ;;  %937 = vmatpush.bf16.msrb.mxu3 %v540_v54 }
 0x1c5   :  { %v473_v59 = vpop.f32.mrf.mxu1 }
 0x1c6   :  { %686 = vmatpush.bf16.msra.mxu2 %v539_v58  ;;  %938 = vmatpush.bf16.msrb.mxu3 %v539_v58  ;;  %v474_v10 = vadd.f32 %v473_v59, %v352_v20  ;;  %v922_v20 = vld [vmem:[%s1276_s5 + $0x8] sm:$0xff]  ;;  %v585_v36 = vpop.permute.xlu1 %584  ;;  %v570_v37 = vpop.permute.xlu2 %569 }
 0x1cd   :  { %v476_v61 = vpop.f32.mrf.mxu1 }
 0x1ce   :  { %v477_v8 = vadd.f32 %v476_v61, %v357_v17  ;;  %v921_v17 = vld [vmem:[%s1276_s5] sm:$0xff]  ;;  %v560_v41 = vpop.permute.xlu1 %559  ;;  %v565_v42 = vpop.permute.xlu2 %564 }
 0x1d0   :  { %v507_v16 = vmax.f32 %v477_v8, 0.0 }
 0x1d5   :  { %v478_v0 = vpop.f32.mrf.mxu1 }
 0x1d6   :  { %v479_v3 = vadd.f32 %v478_v0, %v362_v18  ;;  %v927_v18 = vld [vmem:[%s1276_s5 + $0x30] sm:$0xff] }
 0x1d8   :  { %v508_v11 = vmax.f32 %v479_v3, 0.0 }
 0x1da   :  { %v536_v21 = vpack.c.bf16 %v508_v11, %v507_v16 }
 0x1dd   :  { %v481_v1 = vpop.f32.mrf.mxu1 }
 0x1de   :  { %v482_v60 = vadd.f32 %v481_v1, %v367_v15 }
 0x1e0   :  { %v509_v9 = vmax.f32 %v482_v60, 0.0 }
 0x1e5   :  { %v483_v2 = vpop.f32.mrf.mxu1 }
 0x1e6   :  { %v484_v62 = vadd.f32 %v483_v2, %v372_v23  ;;  %v923_v23 = vld [vmem:[%s1276_s5 + $0x10] sm:$0xff] }
 0x1e8   :  { %v510_v4 = vmax.f32 %v484_v62, 0.0 }
 0x1ea   :  { %v537_v12 = vpack.c.bf16 %v510_v4, %v509_v9 }
 0x1ed   :  { %v486_v5 = vpop.f32.mrf.mxu1 }
 0x1ee   :  { %v487_v6 = vadd.f32 %v486_v5, %v377_v19  ;;  %v506_v19 = vmax.f32 %v474_v10, 0.0 }
 0x1f0   :  { %v511_v52 = vmax.f32 %v487_v6, 0.0 }
 0x1f5   :  { %v488_v56 = vpop.f32.mrf.mxu1 }
 0x1f6   :  { %v489_v57 = vadd.f32 %v488_v56, %v382_v14  ;;  %v505_v14 = vmax.f32 %v472_v13, 0.0 }
 0x1f8   :  { %v512_v63 = vmax.f32 %v489_v57, 0.0  ;;  %v535_v15 = vpack.c.bf16 %v506_v19, %v505_v14 }
 0x1fa   :  { %v538_v7 = vpack.c.bf16 %v512_v63, %v511_v52 }
 0x1fc   :  { %687 = vmatpush.bf16.msra.mxu2 %v538_v7  ;;  %939 = vmatpush.bf16.msrb.mxu3 %v538_v7 }
 0x200   :  { %688 = vmatpush.bf16.msra.mxu2 %v537_v12  ;;  %940 = vmatpush.bf16.msrb.mxu3 %v537_v12 }
 0x204   :  { %689 = vmatpush.bf16.msra.mxu2 %v536_v21  ;;  %941 = vmatpush.bf16.msrb.mxu3 %v536_v21 }
 0x208   :  { %690 = vmatpush.bf16.msra.mxu2 %v535_v15  ;;  %942 = vmatpush.bf16.msrb.mxu3 %v535_v15 }
 0x20c   :  { %691 = vmatpush.bf16.msra.mxu2 %v534_v44  ;;  %943 = vmatpush.bf16.msrb.mxu3 %v534_v44 }
 0x210   :  { %692 = vmatpush.bf16.msra.mxu2 %v1237_v32  ;;  %944 = vmatpush.bf16.msrb.mxu3 %v1237_v32  ;;  %v635_v32 = vpop.permute.xlu0 %634 }
 0x213   :  { %693 = vmatmul.bf16.vlgmr.msra.gmra.mxu2 %v921_v17  ;;  %723 = vmatmul.bf16.vlgmr.msrb.gmra.mxu3 %v927_v18 }
 0x218   :  { %v610_v35 = vpop.permute.xlu0 %609 }
 0x220   :  { %v605_v40 = vpop.permute.xlu0 %604 }
 0x223   :  { %698 = vmatmul.bf16.gmra.mxu2 %v922_v20  ;;  %728 = vmatmul.bf16.gmra.mxu3 %v928_v22 }
 0x228   :  { %v580_v49 = vpop.permute.xlu0 %579 }
 0x230   :  { %v575_v54 = vpop.permute.xlu0 %574 }
 0x233   :  { %703 = vmatmul.bf16.gmra.mxu2 %v923_v23 }
 0x243   :  { %708 = vmatmul.bf16.gmra.mxu2 %v924_v24 }
 0x253   :  { %713 = vmatmul.bf16.gmra.mxu2 %v925_v25 }
 0x263   :  { %718 = vmatmul.bf16.gmra.mxu2 %v926_v26 }
 0x296   :  { %v694_v38 = vpop.f32.mrf.mxu2  ;;  %v724_v39 = vpop.f32.mrf.mxu3 }
 0x297   :  { %v695_v43 = vadd.f32 %v694_v38, %v560_v41  ;;  %v725_v5 = vadd.f32 %v724_v39, %v620_v28 }
 0x299   :  { %v734_v47 = vmax.f32 %v695_v43, 0.0  ;;  %v746_v3 = vmax.f32 %v725_v5, 0.0 }
 0x29e   :  { %v696_v44 = vpop.f32.mrf.mxu2  ;;  %v726_v45 = vpop.f32.mrf.mxu3 }
 0x29f   :  { %v697_v46 = vadd.f32 %v696_v44, %v565_v42  ;;  %v727_v0 = vadd.f32 %v726_v45, %v625_v29 }
 0x2a1   :  { %v735_v48 = vmax.f32 %v697_v46, 0.0  ;;  %v747_v60 = vmax.f32 %v727_v0, 0.0 }
 0x2a3   :  { %v751_v50 = vpack.c.bf16 %v735_v48, %v734_v47  ;;  %v757_v7 = vpack.c.bf16 %v747_v60, %v746_v3 }
 0x2a6   :  { %v699_v51 = vpop.f32.mrf.mxu2  ;;  %v729_v53 = vpop.f32.mrf.mxu3 }
 0x2a7   :  { %v700_v55 = vadd.f32 %v699_v51, %v570_v37  ;;  %v730_v58 = vadd.f32 %v729_v53, %v630_v27 }
 0x2a9   :  { %v736_v6 = vmax.f32 %v700_v55, 0.0  ;;  %v748_v56 = vmax.f32 %v730_v58, 0.0 }
 0x2ae   :  { %v701_v59 = vpop.f32.mrf.mxu2  ;;  %v731_v61 = vpop.f32.mrf.mxu3 }
 0x2af   :  { %v702_v1 = vadd.f32 %v701_v59, %v575_v54  ;;  %v732_v2 = vadd.f32 %v731_v61, %v635_v32 }
 0x2b1   :  { %v737_v62 = vmax.f32 %v702_v1, 0.0  ;;  %v749_v57 = vmax.f32 %v732_v2, 0.0 }
 0x2b3   :  { %v752_v52 = vpack.c.bf16 %v737_v62, %v736_v6  ;;  %v758_v63 = vpack.c.bf16 %v749_v57, %v748_v56 }
 0x2b5   :  { %765 = vmatpush.bf16.msra.mxu3 %v758_v63 }
 0x2b6   :  { %v704_v4 = vpop.f32.mrf.mxu2 }
 0x2b7   :  { %v705_v29 = vadd.f32 %v704_v4, %v580_v49 }
 0x2b9   :  { %766 = vmatpush.bf16.msra.mxu3 %v757_v7  ;;  %v738_v38 = vmax.f32 %v705_v29, 0.0 }
 0x2be   :  { %v706_v8 = vpop.f32.mrf.mxu2 }
 0x2bf   :  { %v707_v26 = vadd.f32 %v706_v8, %v585_v36 }
 0x2c1   :  { %v739_v37 = vmax.f32 %v707_v26, 0.0 }
 0x2c6   :  { %v709_v9 = vpop.f32.mrf.mxu2 }
 0x2c7   :  { %v710_v24 = vadd.f32 %v709_v9, %v590_v33  ;;  %v763_v33 = vpop.permute.xlu0 %762 }
 0x2c9   :  { %v740_v32 = vmax.f32 %v710_v24, 0.0 }
 0x2ce   :  { %v711_v10 = vpop.f32.mrf.mxu2 }
 0x2cf   :  { %v712_v20 = vadd.f32 %v711_v10, %v595_v34 }
 0x2d1   :  { %v741_v27 = vmax.f32 %v712_v20, 0.0 }
 0x2d6   :  { %v714_v11 = vpop.f32.mrf.mxu2 }
 0x2d7   :  { %v715_v15 = vadd.f32 %v714_v11, %v600_v31  ;;  %v750_v31 = vld [vmem:[%s1278_s7] sm:$0x1] }
 0x2d9   :  { %v742_v25 = vmax.f32 %v715_v15, 0.0 }
 0x2de   :  { %v716_v12 = vpop.f32.mrf.mxu2 }
 0x2df   :  { %v717_v21 = vadd.f32 %v716_v12, %v605_v40 }
 0x2e1   :  { %v743_v22 = vmax.f32 %v717_v21, 0.0 }
 0x2e3   :  { %v755_v28 = vpack.c.bf16 %v743_v22, %v742_v25 }
 0x2e6   :  { %v719_v13 = vpop.f32.mrf.mxu2 }
 0x2e7   :  { %v720_v16 = vadd.f32 %v719_v13, %v610_v35  ;;  %v754_v35 = vpack.c.bf16 %v741_v27, %v740_v32 }
 0x2e9   :  { %v744_v17 = vmax.f32 %v720_v16, 0.0 }
 0x2ee   :  { %v721_v19 = vpop.f32.mrf.mxu2 }
 0x2ef   :  { %v722_v14 = vadd.f32 %v721_v19, %v615_v30  ;;  %v753_v30 = vpack.c.bf16 %v739_v37, %v738_v38 }
 0x2f1   :  { %v745_v18 = vmax.f32 %v722_v14, 0.0 }
 0x2f3   :  { %v756_v23 = vpack.c.bf16 %v745_v18, %v744_v17 }
 0x2f5   :  { %767 = vmatpush.bf16.msra.mxu3 %v756_v23 }
 0x2f9   :  { %768 = vmatpush.bf16.msra.mxu3 %v755_v28 }
 0x2fd   :  { %769 = vmatpush.bf16.msra.mxu3 %v754_v35 }
 0x301   :  { %770 = vmatpush.bf16.msra.mxu3 %v753_v30 }
 0x305   :  { %771 = vmatpush.bf16.msra.mxu3 %v752_v52 }
 0x309   :  { %772 = vmatpush.bf16.msra.mxu3 %v751_v50 }
 0x30c   :  { %773 = vmatmul.bf16.vlgmr.msra.gmra.mxu3 %v750_v31 }
 0x38f   :  { %v774_v34 = vpop.f32.mrf.mxu3 }
 0x390   :  { %v775_v36 = vadd.f32 %v774_v34, %v763_v33 }
 0x392   :  { %v778_v39 = vmax.f32 %v775_v36, 0.0 }
 0x394   :  { %779 = vst [vmem:[#allocation2] sm:$0x3] %v778_v39 }
 0x395   :  { %790 = dma.vmem_to_hbm [thread:$0]  %s786_s2, 32, %s788_s15, [#allocation3]  }
 0x397   :  { %v776_v40 = vpop.f32.mrf.mxu3 }
 0x398   :  { %974 = dma.done.wait [#allocation3], 32  }
 0x399   :  { %975 = vsyncadd [#allocation3], 4294967264 }
 0x39a   :  { %795 = vsyncpa [#allocation3], 1 }

</bundles_post_ra>
